<compile_context>
chip_gen: v7x
topology: tpu7x:2x2x1
jax: 0.10.0
libtpu: 0.0.40
codegen_flags: <defaults>
</compile_context>

<pallas_src>
import jax
import jax.numpy as jnp
from jax.experimental import pallas as pl
from jax.experimental.pallas import tpu as pltpu


# ------------------------------- Pallas kernel -------------------------------
def _lstm_forecast_kernel(x2d_ref, wih0_ref, whh0_ref, b0_ref,
                          w1_ref, b1_ref, wfc_ref, bfc_ref, out_ref):
    # x2d : (T*B, D)  time-major rows (row = t*B + b)
    # wih0: (D, 4H)   whh0: (H, 4H)   b0: (1, 4H)   (b0 = b_ih_l0 + b_hh_l0)
    # w1  : (2H, 4H)  stacked [w_ih_l1.T ; w_hh_l1.T]   b1: (1, 4H)
    # wfc : (H, O)    bfc : (1, O)    out: (B, O)
    TB = x2d_ref.shape[0]
    H = whh0_ref.shape[0]
    B = out_ref.shape[0]
    T = TB // B

    whh0 = whh0_ref[...]
    w1 = w1_ref[...]

    # Hoisted layer-0 input projection: one big matmul (T*B LHS rows) + bias,
    # removes an MXU dot + bias broadcast from every timestep's serial chain.
    xp = (jnp.dot(x2d_ref[...], wih0_ref[...],
                  preferred_element_type=jnp.float32)
          + jnp.broadcast_to(b0_ref[...], (TB, 4 * H)))

    # Pre-broadcast the layer-1 bias once (JAX does not CSE broadcast_in_dim).
    b1 = jnp.broadcast_to(b1_ref[...], (B, 4 * H))

    def gates(g):
        # Transcendentals on the whole (B, 4H) = 128-lane tile, then static
        # 32-lane slices.  PyTorch gate order: [i, f, g, o].
        sg = jax.nn.sigmoid(g)
        th = jnp.tanh(g)
        i = sg[:, 0 * H:1 * H]
        f = sg[:, 1 * H:2 * H]
        gg = th[:, 2 * H:3 * H]
        o = sg[:, 3 * H:4 * H]
        return i, f, gg, o

    h0 = jnp.zeros((B, H), jnp.float32)
    c0 = jnp.zeros((B, H), jnp.float32)
    h1 = jnp.zeros((B, H), jnp.float32)
    c1 = jnp.zeros((B, H), jnp.float32)

    # T is small and static -> fully unrolled recurrence (cross-step scheduler
    # visibility, no loop/branch overhead on the latency-bound critical path).
    for t in range(T):
        # ---- layer 0: input part already hoisted; single hidden matmul.
        g0 = xp[t * B:(t + 1) * B, :] + jnp.dot(
            h0, whh0, preferred_element_type=jnp.float32)
        i0, f0, gg0, o0 = gates(g0)
        c0 = f0 * c0 + i0 * gg0
        h0 = o0 * jnp.tanh(c0)

        # ---- layer 1: fused [h0, h1] @ [wih1; whh1], single K=2H matmul.
        #      (inter-layer dropout is identity at inference)
        g1 = jnp.dot(jnp.concatenate([h0, h1], axis=1), w1,
                     preferred_element_type=jnp.float32) + b1
        i1, f1, gg1, o1 = gates(g1)
        c1 = f1 * c1 + i1 * gg1
        h1 = o1 * jnp.tanh(c1)

    # FC head on the last hidden state of the top layer (dropout = identity).
    out_ref[...] = (jnp.dot(h1, wfc_ref[...],
                            preferred_element_type=jnp.float32)
                    + jnp.broadcast_to(bfc_ref[...], out_ref.shape))


# --------------------------------- wrapper -----------------------------------
def lstm_forecast(x, params):
    """x: (B, T, D) float32, batch-first like the PyTorch module."""
    B, T, D = x.shape
    O = params["w_fc"].shape[0]

    # Glue: time-major flattened input, pre-transposed weights, fused biases
    # (b_ih + b_hh), and layer-1 weights stacked along K for the fused matmul.
    x2d = jnp.transpose(x, (1, 0, 2)).reshape(T * B, D).astype(jnp.float32)
    wih0 = params["w_ih_l0"].T                                  # (D, 4H)
    whh0 = params["w_hh_l0"].T                                  # (H, 4H)
    b0 = (params["b_ih_l0"] + params["b_hh_l0"])[None, :]       # (1, 4H)
    w1 = jnp.concatenate([params["w_ih_l1"].T,
                          params["w_hh_l1"].T], axis=0)         # (2H, 4H)
    b1 = (params["b_ih_l1"] + params["b_hh_l1"])[None, :]       # (1, 4H)
    wfc = params["w_fc"].T                                      # (H, O)
    bfc = params["b_fc"][None, :]                               # (1, O)

    # Everything is tiny and resident in VMEM; the recurrence is serial so
    # there is no useful grid at these shapes.
    # TODO(synk): for production T/B, stream x over T (grid + "arbitrary") and
    # shard batch across TensorCores (grid + "parallel") on v7x.
    vmem = pl.BlockSpec(memory_space=pltpu.MemorySpace.VMEM)
    return pl.pallas_call(
        _lstm_forecast_kernel,
        out_shape=jax.ShapeDtypeStruct((B, O), jnp.float32),
        in_specs=[vmem] * 8,
        out_specs=vmem,
    )(x2d, wih0, whh0, b0, w1, b1, wfc, bfc)


# ----------------------------- pure-JAX reference ----------------------------
def _ref_forward(x, params):
    B, T, D = x.shape
    H = params["w_hh_l0"].shape[1]

    def cell(x_t, h, c, wih, whh, bih, bhh):
        g = x_t @ wih.T + bih + h @ whh.T + bhh
        i, f, gg, o = jnp.split(g, 4, axis=1)
        c_new = jax.nn.sigmoid(f) * c + jax.nn.sigmoid(i) * jnp.tanh(gg)
        h_new = jax.nn.sigmoid(o) * jnp.tanh(c_new)
        return h_new, c_new

    h0 = c0 = h1 = c1 = jnp.zeros((B, H), jnp.float32)
    for t in range(T):
        h0, c0 = cell(x[:, t, :], h0, c0, params["w_ih_l0"], params["w_hh_l0"],
                      params["b_ih_l0"], params["b_hh_l0"])
        h1, c1 = cell(h0, h1, c1, params["w_ih_l1"], params["w_hh_l1"],
                      params["b_ih_l1"], params["b_hh_l1"])
    return h1 @ params["w_fc"].T + params["b_fc"]


# ------------------------------- param init ----------------------------------
def init_params(key, input_dim, hidden_dim, output_len):
    k = 1.0 / jnp.sqrt(hidden_dim)
    names_shapes = [
        ("w_ih_l0", (4 * hidden_dim, input_dim)),
        ("w_hh_l0", (4 * hidden_dim, hidden_dim)),
        ("b_ih_l0", (4 * hidden_dim,)),
        ("b_hh_l0", (4 * hidden_dim,)),
        ("w_ih_l1", (4 * hidden_dim, hidden_dim)),
        ("w_hh_l1", (4 * hidden_dim, hidden_dim)),
        ("b_ih_l1", (4 * hidden_dim,)),
        ("b_hh_l1", (4 * hidden_dim,)),
        ("w_fc", (output_len, hidden_dim)),
        ("b_fc", (output_len,)),
    ]
    params = {}
    for name, shape in names_shapes:
        key, sub = jax.random.split(key)
        params[name] = jax.random.uniform(sub, shape, jnp.float32, -k, k)
    return params


if __name__ == "__main__":
    # Small shapes consistent with the module: batch=2, seq=8, input_dim=4,
    # hidden_dim=32, num_layers=2, output_len=16.
    B, T, D, H, O = 2, 8, 4, 32, 16

    key = jax.random.PRNGKey(0)
    key, kx = jax.random.split(key)
    x = jax.random.normal(kx, (B, T, D), jnp.float32)
    params = init_params(key, D, H, O)

    out = lstm_forecast(x, params)
    out = jax.block_until_ready(out)

    ref = _ref_forward(x, params)
    assert out.shape == (B, O)
    assert jnp.allclose(out, ref, atol=1e-4, rtol=1e-4), (
        f"max abs err {jnp.max(jnp.abs(out - ref))}")

    print("KERNEL_OK")
</pallas_src>

<mosaic_0001>
module attributes {stable_mosaic.version = 11 : i64} {
  func.func @_lstm_forecast_kernel(%arg0: memref<16x4xf32, #tpu.memory_space<vmem>>, %arg1: memref<4x128xf32, #tpu.memory_space<vmem>>, %arg2: memref<32x128xf32, #tpu.memory_space<vmem>>, %arg3: memref<1x128xf32, #tpu.memory_space<vmem>>, %arg4: memref<64x128xf32, #tpu.memory_space<vmem>>, %arg5: memref<1x128xf32, #tpu.memory_space<vmem>>, %arg6: memref<32x16xf32, #tpu.memory_space<vmem>>, %arg7: memref<1x16xf32, #tpu.memory_space<vmem>>, %arg8: memref<2x16xf32, #tpu.memory_space<vmem>>) attributes {dimension_semantics = [], scalar_prefetch = 0 : i64, scratch_operands = 0 : i64, tpu.core_type = #tpu.core_type<tc>} {
    %c0 = arith.constant 0 : index
    %c0_0 = arith.constant 0 : index
    %0 = vector.load %arg2[%c0, %c0_0] : memref<32x128xf32, #tpu.memory_space<vmem>>, vector<32x128xf32>
    %c0_1 = arith.constant 0 : index
    %c0_2 = arith.constant 0 : index
    %1 = vector.load %arg4[%c0_1, %c0_2] : memref<64x128xf32, #tpu.memory_space<vmem>>, vector<64x128xf32>
    %c0_3 = arith.constant 0 : index
    %c0_4 = arith.constant 0 : index
    %2 = vector.load %arg0[%c0_3, %c0_4] : memref<16x4xf32, #tpu.memory_space<vmem>>, vector<16x4xf32>
    %c0_5 = arith.constant 0 : index
    %c0_6 = arith.constant 0 : index
    %3 = vector.load %arg1[%c0_5, %c0_6] : memref<4x128xf32, #tpu.memory_space<vmem>>, vector<4x128xf32>
    %cst = arith.constant dense<0.000000e+00> : vector<16x128xf32>
    %4 = tpu.matmul %2, %3, %cst {dimension_numbers = #tpu.dot_dimension_numbers<[1], [0], [0], [1], [0, 0, 1, 1], [], []>} : vector<16x4xf32>, vector<4x128xf32>, vector<16x128xf32> -> vector<16x128xf32>
    %c0_7 = arith.constant 0 : index
    %c0_8 = arith.constant 0 : index
    %5 = vector.load %arg3[%c0_7, %c0_8] : memref<1x128xf32, #tpu.memory_space<vmem>>, vector<1x128xf32>
    %6 = vector.shape_cast %5 : vector<1x128xf32> to vector<1x128xf32>
    %7 = vector.broadcast %6 : vector<1x128xf32> to vector<16x128xf32>
    %8 = arith.addf %4, %7 : vector<16x128xf32>
    %c0_9 = arith.constant 0 : index
    %c0_10 = arith.constant 0 : index
    %9 = vector.load %arg5[%c0_9, %c0_10] : memref<1x128xf32, #tpu.memory_space<vmem>>, vector<1x128xf32>
    %10 = vector.shape_cast %9 : vector<1x128xf32> to vector<1x128xf32>
    %11 = vector.broadcast %10 : vector<1x128xf32> to vector<2x128xf32>
    %cst_11 = arith.constant 0.000000e+00 : f32
    %12 = vector.broadcast %cst_11 : f32 to vector<2x32xf32>
    %cst_12 = arith.constant 0.000000e+00 : f32
    %13 = vector.broadcast %cst_12 : f32 to vector<2x32xf32>
    %cst_13 = arith.constant 0.000000e+00 : f32
    %14 = vector.broadcast %cst_13 : f32 to vector<2x32xf32>
    %cst_14 = arith.constant 0.000000e+00 : f32
    %15 = vector.broadcast %cst_14 : f32 to vector<2x32xf32>
    %16 = vector.extract_strided_slice %8 {offsets = [0, 0], sizes = [2, 128], strides = [1, 1]} : vector<16x128xf32> to vector<2x128xf32>
    %cst_15 = arith.constant dense<0.000000e+00> : vector<2x128xf32>
    %17 = tpu.matmul %12, %0, %cst_15 {dimension_numbers = #tpu.dot_dimension_numbers<[1], [0], [0], [1], [0, 0, 1, 1], [], []>} : vector<2x32xf32>, vector<32x128xf32>, vector<2x128xf32> -> vector<2x128xf32>
    %18 = arith.addf %16, %17 : vector<2x128xf32>
    %19 = arith.negf %18 : vector<2x128xf32>
    %20 = math.exp %19 : vector<2x128xf32>
    %cst_16 = arith.constant 1.000000e+00 : f32
    %21 = vector.broadcast %cst_16 : f32 to vector<2x128xf32>
    %22 = arith.addf %21, %20 : vector<2x128xf32>
    %23 = arith.divf %21, %22 : vector<2x128xf32>
    %24 = math.tanh %18 : vector<2x128xf32>
    %25 = vector.extract_strided_slice %23 {offsets = [0, 0], sizes = [2, 32], strides = [1, 1]} : vector<2x128xf32> to vector<2x32xf32>
    %26 = vector.extract_strided_slice %23 {offsets = [0, 32], sizes = [2, 32], strides = [1, 1]} : vector<2x128xf32> to vector<2x32xf32>
    %27 = vector.extract_strided_slice %24 {offsets = [0, 64], sizes = [2, 32], strides = [1, 1]} : vector<2x128xf32> to vector<2x32xf32>
    %28 = vector.extract_strided_slice %23 {offsets = [0, 96], sizes = [2, 32], strides = [1, 1]} : vector<2x128xf32> to vector<2x32xf32>
    %29 = arith.mulf %26, %13 : vector<2x32xf32>
    %30 = arith.mulf %25, %27 : vector<2x32xf32>
    %31 = arith.addf %29, %30 : vector<2x32xf32>
    %32 = math.tanh %31 : vector<2x32xf32>
    %33 = arith.mulf %28, %32 : vector<2x32xf32>
    %34 = tpu.concatenate %33, %14 in 1 : vector<2x32xf32>, vector<2x32xf32> -> vector<2x64xf32>
    %cst_17 = arith.constant dense<0.000000e+00> : vector<2x128xf32>
    %35 = tpu.matmul %34, %1, %cst_17 {dimension_numbers = #tpu.dot_dimension_numbers<[1], [0], [0], [1], [0, 0, 1, 1], [], []>} : vector<2x64xf32>, vector<64x128xf32>, vector<2x128xf32> -> vector<2x128xf32>
    %36 = arith.addf %35, %11 : vector<2x128xf32>
    %37 = arith.negf %36 : vector<2x128xf32>
    %38 = math.exp %37 : vector<2x128xf32>
    %cst_18 = arith.constant 1.000000e+00 : f32
    %39 = vector.broadcast %cst_18 : f32 to vector<2x128xf32>
    %40 = arith.addf %39, %38 : vector<2x128xf32>
    %41 = arith.divf %39, %40 : vector<2x128xf32>
    %42 = math.tanh %36 : vector<2x128xf32>
    %43 = vector.extract_strided_slice %41 {offsets = [0, 0], sizes = [2, 32], strides = [1, 1]} : vector<2x128xf32> to vector<2x32xf32>
    %44 = vector.extract_strided_slice %41 {offsets = [0, 32], sizes = [2, 32], strides = [1, 1]} : vector<2x128xf32> to vector<2x32xf32>
    %45 = vector.extract_strided_slice %42 {offsets = [0, 64], sizes = [2, 32], strides = [1, 1]} : vector<2x128xf32> to vector<2x32xf32>
    %46 = vector.extract_strided_slice %41 {offsets = [0, 96], sizes = [2, 32], strides = [1, 1]} : vector<2x128xf32> to vector<2x32xf32>
    %47 = arith.mulf %44, %15 : vector<2x32xf32>
    %48 = arith.mulf %43, %45 : vector<2x32xf32>
    %49 = arith.addf %47, %48 : vector<2x32xf32>
    %50 = math.tanh %49 : vector<2x32xf32>
    %51 = arith.mulf %46, %50 : vector<2x32xf32>
    %52 = vector.extract_strided_slice %8 {offsets = [2, 0], sizes = [2, 128], strides = [1, 1]} : vector<16x128xf32> to vector<2x128xf32>
    %cst_19 = arith.constant dense<0.000000e+00> : vector<2x128xf32>
    %53 = tpu.matmul %33, %0, %cst_19 {dimension_numbers = #tpu.dot_dimension_numbers<[1], [0], [0], [1], [0, 0, 1, 1], [], []>} : vector<2x32xf32>, vector<32x128xf32>, vector<2x128xf32> -> vector<2x128xf32>
    %54 = arith.addf %52, %53 : vector<2x128xf32>
    %55 = arith.negf %54 : vector<2x128xf32>
    %56 = math.exp %55 : vector<2x128xf32>
    %cst_20 = arith.constant 1.000000e+00 : f32
    %57 = vector.broadcast %cst_20 : f32 to vector<2x128xf32>
    %58 = arith.addf %57, %56 : vector<2x128xf32>
    %59 = arith.divf %57, %58 : vector<2x128xf32>
    %60 = math.tanh %54 : vector<2x128xf32>
    %61 = vector.extract_strided_slice %59 {offsets = [0, 0], sizes = [2, 32], strides = [1, 1]} : vector<2x128xf32> to vector<2x32xf32>
    %62 = vector.extract_strided_slice %59 {offsets = [0, 32], sizes = [2, 32], strides = [1, 1]} : vector<2x128xf32> to vector<2x32xf32>
    %63 = vector.extract_strided_slice %60 {offsets = [0, 64], sizes = [2, 32], strides = [1, 1]} : vector<2x128xf32> to vector<2x32xf32>
    %64 = vector.extract_strided_slice %59 {offsets = [0, 96], sizes = [2, 32], strides = [1, 1]} : vector<2x128xf32> to vector<2x32xf32>
    %65 = arith.mulf %62, %31 : vector<2x32xf32>
    %66 = arith.mulf %61, %63 : vector<2x32xf32>
    %67 = arith.addf %65, %66 : vector<2x32xf32>
    %68 = math.tanh %67 : vector<2x32xf32>
    %69 = arith.mulf %64, %68 : vector<2x32xf32>
    %70 = tpu.concatenate %69, %51 in 1 : vector<2x32xf32>, vector<2x32xf32> -> vector<2x64xf32>
    %cst_21 = arith.constant dense<0.000000e+00> : vector<2x128xf32>
    %71 = tpu.matmul %70, %1, %cst_21 {dimension_numbers = #tpu.dot_dimension_numbers<[1], [0], [0], [1], [0, 0, 1, 1], [], []>} : vector<2x64xf32>, vector<64x128xf32>, vector<2x128xf32> -> vector<2x128xf32>
    %72 = arith.addf %71, %11 : vector<2x128xf32>
    %73 = arith.negf %72 : vector<2x128xf32>
    %74 = math.exp %73 : vector<2x128xf32>
    %cst_22 = arith.constant 1.000000e+00 : f32
    %75 = vector.broadcast %cst_22 : f32 to vector<2x128xf32>
    %76 = arith.addf %75, %74 : vector<2x128xf32>
    %77 = arith.divf %75, %76 : vector<2x128xf32>
    %78 = math.tanh %72 : vector<2x128xf32>
    %79 = vector.extract_strided_slice %77 {offsets = [0, 0], sizes = [2, 32], strides = [1, 1]} : vector<2x128xf32> to vector<2x32xf32>
    %80 = vector.extract_strided_slice %77 {offsets = [0, 32], sizes = [2, 32], strides = [1, 1]} : vector<2x128xf32> to vector<2x32xf32>
    %81 = vector.extract_strided_slice %78 {offsets = [0, 64], sizes = [2, 32], strides = [1, 1]} : vector<2x128xf32> to vector<2x32xf32>
    %82 = vector.extract_strided_slice %77 {offsets = [0, 96], sizes = [2, 32], strides = [1, 1]} : vector<2x128xf32> to vector<2x32xf32>
    %83 = arith.mulf %80, %49 : vector<2x32xf32>
    %84 = arith.mulf %79, %81 : vector<2x32xf32>
    %85 = arith.addf %83, %84 : vector<2x32xf32>
    %86 = math.tanh %85 : vector<2x32xf32>
    %87 = arith.mulf %82, %86 : vector<2x32xf32>
    %88 = vector.extract_strided_slice %8 {offsets = [4, 0], sizes = [2, 128], strides = [1, 1]} : vector<16x128xf32> to vector<2x128xf32>
    %cst_23 = arith.constant dense<0.000000e+00> : vector<2x128xf32>
    %89 = tpu.matmul %69, %0, %cst_23 {dimension_numbers = #tpu.dot_dimension_numbers<[1], [0], [0], [1], [0, 0, 1, 1], [], []>} : vector<2x32xf32>, vector<32x128xf32>, vector<2x128xf32> -> vector<2x128xf32>
    %90 = arith.addf %88, %89 : vector<2x128xf32>
    %91 = arith.negf %90 : vector<2x128xf32>
    %92 = math.exp %91 : vector<2x128xf32>
    %cst_24 = arith.constant 1.000000e+00 : f32
    %93 = vector.broadcast %cst_24 : f32 to vector<2x128xf32>
    %94 = arith.addf %93, %92 : vector<2x128xf32>
    %95 = arith.divf %93, %94 : vector<2x128xf32>
    %96 = math.tanh %90 : vector<2x128xf32>
    %97 = vector.extract_strided_slice %95 {offsets = [0, 0], sizes = [2, 32], strides = [1, 1]} : vector<2x128xf32> to vector<2x32xf32>
    %98 = vector.extract_strided_slice %95 {offsets = [0, 32], sizes = [2, 32], strides = [1, 1]} : vector<2x128xf32> to vector<2x32xf32>
    %99 = vector.extract_strided_slice %96 {offsets = [0, 64], sizes = [2, 32], strides = [1, 1]} : vector<2x128xf32> to vector<2x32xf32>
    %100 = vector.extract_strided_slice %95 {offsets = [0, 96], sizes = [2, 32], strides = [1, 1]} : vector<2x128xf32> to vector<2x32xf32>
    %101 = arith.mulf %98, %67 : vector<2x32xf32>
    %102 = arith.mulf %97, %99 : vector<2x32xf32>
    %103 = arith.addf %101, %102 : vector<2x32xf32>
    %104 = math.tanh %103 : vector<2x32xf32>
    %105 = arith.mulf %100, %104 : vector<2x32xf32>
    %106 = tpu.concatenate %105, %87 in 1 : vector<2x32xf32>, vector<2x32xf32> -> vector<2x64xf32>
    %cst_25 = arith.constant dense<0.000000e+00> : vector<2x128xf32>
    %107 = tpu.matmul %106, %1, %cst_25 {dimension_numbers = #tpu.dot_dimension_numbers<[1], [0], [0], [1], [0, 0, 1, 1], [], []>} : vector<2x64xf32>, vector<64x128xf32>, vector<2x128xf32> -> vector<2x128xf32>
    %108 = arith.addf %107, %11 : vector<2x128xf32>
    %109 = arith.negf %108 : vector<2x128xf32>
    %110 = math.exp %109 : vector<2x128xf32>
    %cst_26 = arith.constant 1.000000e+00 : f32
    %111 = vector.broadcast %cst_26 : f32 to vector<2x128xf32>
    %112 = arith.addf %111, %110 : vector<2x128xf32>
    %113 = arith.divf %111, %112 : vector<2x128xf32>
    %114 = math.tanh %108 : vector<2x128xf32>
    %115 = vector.extract_strided_slice %113 {offsets = [0, 0], sizes = [2, 32], strides = [1, 1]} : vector<2x128xf32> to vector<2x32xf32>
    %116 = vector.extract_strided_slice %113 {offsets = [0, 32], sizes = [2, 32], strides = [1, 1]} : vector<2x128xf32> to vector<2x32xf32>
    %117 = vector.extract_strided_slice %114 {offsets = [0, 64], sizes = [2, 32], strides = [1, 1]} : vector<2x128xf32> to vector<2x32xf32>
    %118 = vector.extract_strided_slice %113 {offsets = [0, 96], sizes = [2, 32], strides = [1, 1]} : vector<2x128xf32> to vector<2x32xf32>
    %119 = arith.mulf %116, %85 : vector<2x32xf32>
    %120 = arith.mulf %115, %117 : vector<2x32xf32>
    %121 = arith.addf %119, %120 : vector<2x32xf32>
    %122 = math.tanh %121 : vector<2x32xf32>
    %123 = arith.mulf %118, %122 : vector<2x32xf32>
    %124 = vector.extract_strided_slice %8 {offsets = [6, 0], sizes = [2, 128], strides = [1, 1]} : vector<16x128xf32> to vector<2x128xf32>
    %cst_27 = arith.constant dense<0.000000e+00> : vector<2x128xf32>
    %125 = tpu.matmul %105, %0, %cst_27 {dimension_numbers = #tpu.dot_dimension_numbers<[1], [0], [0], [1], [0, 0, 1, 1], [], []>} : vector<2x32xf32>, vector<32x128xf32>, vector<2x128xf32> -> vector<2x128xf32>
    %126 = arith.addf %124, %125 : vector<2x128xf32>
    %127 = arith.negf %126 : vector<2x128xf32>
    %128 = math.exp %127 : vector<2x128xf32>
    %cst_28 = arith.constant 1.000000e+00 : f32
    %129 = vector.broadcast %cst_28 : f32 to vector<2x128xf32>
    %130 = arith.addf %129, %128 : vector<2x128xf32>
    %131 = arith.divf %129, %130 : vector<2x128xf32>
    %132 = math.tanh %126 : vector<2x128xf32>
    %133 = vector.extract_strided_slice %131 {offsets = [0, 0], sizes = [2, 32], strides = [1, 1]} : vector<2x128xf32> to vector<2x32xf32>
    %134 = vector.extract_strided_slice %131 {offsets = [0, 32], sizes = [2, 32], strides = [1, 1]} : vector<2x128xf32> to vector<2x32xf32>
    %135 = vector.extract_strided_slice %132 {offsets = [0, 64], sizes = [2, 32], strides = [1, 1]} : vector<2x128xf32> to vector<2x32xf32>
    %136 = vector.extract_strided_slice %131 {offsets = [0, 96], sizes = [2, 32], strides = [1, 1]} : vector<2x128xf32> to vector<2x32xf32>
    %137 = arith.mulf %134, %103 : vector<2x32xf32>
    %138 = arith.mulf %133, %135 : vector<2x32xf32>
    %139 = arith.addf %137, %138 : vector<2x32xf32>
    %140 = math.tanh %139 : vector<2x32xf32>
    %141 = arith.mulf %136, %140 : vector<2x32xf32>
    %142 = tpu.concatenate %141, %123 in 1 : vector<2x32xf32>, vector<2x32xf32> -> vector<2x64xf32>
    %cst_29 = arith.constant dense<0.000000e+00> : vector<2x128xf32>
    %143 = tpu.matmul %142, %1, %cst_29 {dimension_numbers = #tpu.dot_dimension_numbers<[1], [0], [0], [1], [0, 0, 1, 1], [], []>} : vector<2x64xf32>, vector<64x128xf32>, vector<2x128xf32> -> vector<2x128xf32>
    %144 = arith.addf %143, %11 : vector<2x128xf32>
    %145 = arith.negf %144 : vector<2x128xf32>
    %146 = math.exp %145 : vector<2x128xf32>
    %cst_30 = arith.constant 1.000000e+00 : f32
    %147 = vector.broadcast %cst_30 : f32 to vector<2x128xf32>
    %148 = arith.addf %147, %146 : vector<2x128xf32>
    %149 = arith.divf %147, %148 : vector<2x128xf32>
    %150 = math.tanh %144 : vector<2x128xf32>
    %151 = vector.extract_strided_slice %149 {offsets = [0, 0], sizes = [2, 32], strides = [1, 1]} : vector<2x128xf32> to vector<2x32xf32>
    %152 = vector.extract_strided_slice %149 {offsets = [0, 32], sizes = [2, 32], strides = [1, 1]} : vector<2x128xf32> to vector<2x32xf32>
    %153 = vector.extract_strided_slice %150 {offsets = [0, 64], sizes = [2, 32], strides = [1, 1]} : vector<2x128xf32> to vector<2x32xf32>
    %154 = vector.extract_strided_slice %149 {offsets = [0, 96], sizes = [2, 32], strides = [1, 1]} : vector<2x128xf32> to vector<2x32xf32>
    %155 = arith.mulf %152, %121 : vector<2x32xf32>
    %156 = arith.mulf %151, %153 : vector<2x32xf32>
    %157 = arith.addf %155, %156 : vector<2x32xf32>
    %158 = math.tanh %157 : vector<2x32xf32>
    %159 = arith.mulf %154, %158 : vector<2x32xf32>
    %160 = vector.extract_strided_slice %8 {offsets = [8, 0], sizes = [2, 128], strides = [1, 1]} : vector<16x128xf32> to vector<2x128xf32>
    %cst_31 = arith.constant dense<0.000000e+00> : vector<2x128xf32>
    %161 = tpu.matmul %141, %0, %cst_31 {dimension_numbers = #tpu.dot_dimension_numbers<[1], [0], [0], [1], [0, 0, 1, 1], [], []>} : vector<2x32xf32>, vector<32x128xf32>, vector<2x128xf32> -> vector<2x128xf32>
    %162 = arith.addf %160, %161 : vector<2x128xf32>
    %163 = arith.negf %162 : vector<2x128xf32>
    %164 = math.exp %163 : vector<2x128xf32>
    %cst_32 = arith.constant 1.000000e+00 : f32
    %165 = vector.broadcast %cst_32 : f32 to vector<2x128xf32>
    %166 = arith.addf %165, %164 : vector<2x128xf32>
    %167 = arith.divf %165, %166 : vector<2x128xf32>
    %168 = math.tanh %162 : vector<2x128xf32>
    %169 = vector.extract_strided_slice %167 {offsets = [0, 0], sizes = [2, 32], strides = [1, 1]} : vector<2x128xf32> to vector<2x32xf32>
    %170 = vector.extract_strided_slice %167 {offsets = [0, 32], sizes = [2, 32], strides = [1, 1]} : vector<2x128xf32> to vector<2x32xf32>
    %171 = vector.extract_strided_slice %168 {offsets = [0, 64], sizes = [2, 32], strides = [1, 1]} : vector<2x128xf32> to vector<2x32xf32>
    %172 = vector.extract_strided_slice %167 {offsets = [0, 96], sizes = [2, 32], strides = [1, 1]} : vector<2x128xf32> to vector<2x32xf32>
    %173 = arith.mulf %170, %139 : vector<2x32xf32>
    %174 = arith.mulf %169, %171 : vector<2x32xf32>
    %175 = arith.addf %173, %174 : vector<2x32xf32>
    %176 = math.tanh %175 : vector<2x32xf32>
    %177 = arith.mulf %172, %176 : vector<2x32xf32>
    %178 = tpu.concatenate %177, %159 in 1 : vector<2x32xf32>, vector<2x32xf32> -> vector<2x64xf32>
    %cst_33 = arith.constant dense<0.000000e+00> : vector<2x128xf32>
    %179 = tpu.matmul %178, %1, %cst_33 {dimension_numbers = #tpu.dot_dimension_numbers<[1], [0], [0], [1], [0, 0, 1, 1], [], []>} : vector<2x64xf32>, vector<64x128xf32>, vector<2x128xf32> -> vector<2x128xf32>
    %180 = arith.addf %179, %11 : vector<2x128xf32>
    %181 = arith.negf %180 : vector<2x128xf32>
    %182 = math.exp %181 : vector<2x128xf32>
    %cst_34 = arith.constant 1.000000e+00 : f32
    %183 = vector.broadcast %cst_34 : f32 to vector<2x128xf32>
    %184 = arith.addf %183, %182 : vector<2x128xf32>
    %185 = arith.divf %183, %184 : vector<2x128xf32>
    %186 = math.tanh %180 : vector<2x128xf32>
    %187 = vector.extract_strided_slice %185 {offsets = [0, 0], sizes = [2, 32], strides = [1, 1]} : vector<2x128xf32> to vector<2x32xf32>
    %188 = vector.extract_strided_slice %185 {offsets = [0, 32], sizes = [2, 32], strides = [1, 1]} : vector<2x128xf32> to vector<2x32xf32>
    %189 = vector.extract_strided_slice %186 {offsets = [0, 64], sizes = [2, 32], strides = [1, 1]} : vector<2x128xf32> to vector<2x32xf32>
    %190 = vector.extract_strided_slice %185 {offsets = [0, 96], sizes = [2, 32], strides = [1, 1]} : vector<2x128xf32> to vector<2x32xf32>
    %191 = arith.mulf %188, %157 : vector<2x32xf32>
    %192 = arith.mulf %187, %189 : vector<2x32xf32>
    %193 = arith.addf %191, %192 : vector<2x32xf32>
    %194 = math.tanh %193 : vector<2x32xf32>
    %195 = arith.mulf %190, %194 : vector<2x32xf32>
    %196 = vector.extract_strided_slice %8 {offsets = [10, 0], sizes = [2, 128], strides = [1, 1]} : vector<16x128xf32> to vector<2x128xf32>
    %cst_35 = arith.constant dense<0.000000e+00> : vector<2x128xf32>
    %197 = tpu.matmul %177, %0, %cst_35 {dimension_numbers = #tpu.dot_dimension_numbers<[1], [0], [0], [1], [0, 0, 1, 1], [], []>} : vector<2x32xf32>, vector<32x128xf32>, vector<2x128xf32> -> vector<2x128xf32>
    %198 = arith.addf %196, %197 : vector<2x128xf32>
    %199 = arith.negf %198 : vector<2x128xf32>
    %200 = math.exp %199 : vector<2x128xf32>
    %cst_36 = arith.constant 1.000000e+00 : f32
    %201 = vector.broadcast %cst_36 : f32 to vector<2x128xf32>
    %202 = arith.addf %201, %200 : vector<2x128xf32>
    %203 = arith.divf %201, %202 : vector<2x128xf32>
    %204 = math.tanh %198 : vector<2x128xf32>
    %205 = vector.extract_strided_slice %203 {offsets = [0, 0], sizes = [2, 32], strides = [1, 1]} : vector<2x128xf32> to vector<2x32xf32>
    %206 = vector.extract_strided_slice %203 {offsets = [0, 32], sizes = [2, 32], strides = [1, 1]} : vector<2x128xf32> to vector<2x32xf32>
    %207 = vector.extract_strided_slice %204 {offsets = [0, 64], sizes = [2, 32], strides = [1, 1]} : vector<2x128xf32> to vector<2x32xf32>
    %208 = vector.extract_strided_slice %203 {offsets = [0, 96], sizes = [2, 32], strides = [1, 1]} : vector<2x128xf32> to vector<2x32xf32>
    %209 = arith.mulf %206, %175 : vector<2x32xf32>
    %210 = arith.mulf %205, %207 : vector<2x32xf32>
    %211 = arith.addf %209, %210 : vector<2x32xf32>
    %212 = math.tanh %211 : vector<2x32xf32>
    %213 = arith.mulf %208, %212 : vector<2x32xf32>
    %214 = tpu.concatenate %213, %195 in 1 : vector<2x32xf32>, vector<2x32xf32> -> vector<2x64xf32>
    %cst_37 = arith.constant dense<0.000000e+00> : vector<2x128xf32>
    %215 = tpu.matmul %214, %1, %cst_37 {dimension_numbers = #tpu.dot_dimension_numbers<[1], [0], [0], [1], [0, 0, 1, 1], [], []>} : vector<2x64xf32>, vector<64x128xf32>, vector<2x128xf32> -> vector<2x128xf32>
    %216 = arith.addf %215, %11 : vector<2x128xf32>
    %217 = arith.negf %216 : vector<2x128xf32>
    %218 = math.exp %217 : vector<2x128xf32>
    %cst_38 = arith.constant 1.000000e+00 : f32
    %219 = vector.broadcast %cst_38 : f32 to vector<2x128xf32>
    %220 = arith.addf %219, %218 : vector<2x128xf32>
    %221 = arith.divf %219, %220 : vector<2x128xf32>
    %222 = math.tanh %216 : vector<2x128xf32>
    %223 = vector.extract_strided_slice %221 {offsets = [0, 0], sizes = [2, 32], strides = [1, 1]} : vector<2x128xf32> to vector<2x32xf32>
    %224 = vector.extract_strided_slice %221 {offsets = [0, 32], sizes = [2, 32], strides = [1, 1]} : vector<2x128xf32> to vector<2x32xf32>
    %225 = vector.extract_strided_slice %222 {offsets = [0, 64], sizes = [2, 32], strides = [1, 1]} : vector<2x128xf32> to vector<2x32xf32>
    %226 = vector.extract_strided_slice %221 {offsets = [0, 96], sizes = [2, 32], strides = [1, 1]} : vector<2x128xf32> to vector<2x32xf32>
    %227 = arith.mulf %224, %193 : vector<2x32xf32>
    %228 = arith.mulf %223, %225 : vector<2x32xf32>
    %229 = arith.addf %227, %228 : vector<2x32xf32>
    %230 = math.tanh %229 : vector<2x32xf32>
    %231 = arith.mulf %226, %230 : vector<2x32xf32>
    %232 = vector.extract_strided_slice %8 {offsets = [12, 0], sizes = [2, 128], strides = [1, 1]} : vector<16x128xf32> to vector<2x128xf32>
    %cst_39 = arith.constant dense<0.000000e+00> : vector<2x128xf32>
    %233 = tpu.matmul %213, %0, %cst_39 {dimension_numbers = #tpu.dot_dimension_numbers<[1], [0], [0], [1], [0, 0, 1, 1], [], []>} : vector<2x32xf32>, vector<32x128xf32>, vector<2x128xf32> -> vector<2x128xf32>
    %234 = arith.addf %232, %233 : vector<2x128xf32>
    %235 = arith.negf %234 : vector<2x128xf32>
    %236 = math.exp %235 : vector<2x128xf32>
    %cst_40 = arith.constant 1.000000e+00 : f32
    %237 = vector.broadcast %cst_40 : f32 to vector<2x128xf32>
    %238 = arith.addf %237, %236 : vector<2x128xf32>
    %239 = arith.divf %237, %238 : vector<2x128xf32>
    %240 = math.tanh %234 : vector<2x128xf32>
    %241 = vector.extract_strided_slice %239 {offsets = [0, 0], sizes = [2, 32], strides = [1, 1]} : vector<2x128xf32> to vector<2x32xf32>
    %242 = vector.extract_strided_slice %239 {offsets = [0, 32], sizes = [2, 32], strides = [1, 1]} : vector<2x128xf32> to vector<2x32xf32>
    %243 = vector.extract_strided_slice %240 {offsets = [0, 64], sizes = [2, 32], strides = [1, 1]} : vector<2x128xf32> to vector<2x32xf32>
    %244 = vector.extract_strided_slice %239 {offsets = [0, 96], sizes = [2, 32], strides = [1, 1]} : vector<2x128xf32> to vector<2x32xf32>
    %245 = arith.mulf %242, %211 : vector<2x32xf32>
    %246 = arith.mulf %241, %243 : vector<2x32xf32>
    %247 = arith.addf %245, %246 : vector<2x32xf32>
    %248 = math.tanh %247 : vector<2x32xf32>
    %249 = arith.mulf %244, %248 : vector<2x32xf32>
    %250 = tpu.concatenate %249, %231 in 1 : vector<2x32xf32>, vector<2x32xf32> -> vector<2x64xf32>
    %cst_41 = arith.constant dense<0.000000e+00> : vector<2x128xf32>
    %251 = tpu.matmul %250, %1, %cst_41 {dimension_numbers = #tpu.dot_dimension_numbers<[1], [0], [0], [1], [0, 0, 1, 1], [], []>} : vector<2x64xf32>, vector<64x128xf32>, vector<2x128xf32> -> vector<2x128xf32>
    %252 = arith.addf %251, %11 : vector<2x128xf32>
    %253 = arith.negf %252 : vector<2x128xf32>
    %254 = math.exp %253 : vector<2x128xf32>
    %cst_42 = arith.constant 1.000000e+00 : f32
    %255 = vector.broadcast %cst_42 : f32 to vector<2x128xf32>
    %256 = arith.addf %255, %254 : vector<2x128xf32>
    %257 = arith.divf %255, %256 : vector<2x128xf32>
    %258 = math.tanh %252 : vector<2x128xf32>
    %259 = vector.extract_strided_slice %257 {offsets = [0, 0], sizes = [2, 32], strides = [1, 1]} : vector<2x128xf32> to vector<2x32xf32>
    %260 = vector.extract_strided_slice %257 {offsets = [0, 32], sizes = [2, 32], strides = [1, 1]} : vector<2x128xf32> to vector<2x32xf32>
    %261 = vector.extract_strided_slice %258 {offsets = [0, 64], sizes = [2, 32], strides = [1, 1]} : vector<2x128xf32> to vector<2x32xf32>
    %262 = vector.extract_strided_slice %257 {offsets = [0, 96], sizes = [2, 32], strides = [1, 1]} : vector<2x128xf32> to vector<2x32xf32>
    %263 = arith.mulf %260, %229 : vector<2x32xf32>
    %264 = arith.mulf %259, %261 : vector<2x32xf32>
    %265 = arith.addf %263, %264 : vector<2x32xf32>
    %266 = math.tanh %265 : vector<2x32xf32>
    %267 = arith.mulf %262, %266 : vector<2x32xf32>
    %268 = vector.extract_strided_slice %8 {offsets = [14, 0], sizes = [2, 128], strides = [1, 1]} : vector<16x128xf32> to vector<2x128xf32>
    %cst_43 = arith.constant dense<0.000000e+00> : vector<2x128xf32>
    %269 = tpu.matmul %249, %0, %cst_43 {dimension_numbers = #tpu.dot_dimension_numbers<[1], [0], [0], [1], [0, 0, 1, 1], [], []>} : vector<2x32xf32>, vector<32x128xf32>, vector<2x128xf32> -> vector<2x128xf32>
    %270 = arith.addf %268, %269 : vector<2x128xf32>
    %271 = arith.negf %270 : vector<2x128xf32>
    %272 = math.exp %271 : vector<2x128xf32>
    %cst_44 = arith.constant 1.000000e+00 : f32
    %273 = vector.broadcast %cst_44 : f32 to vector<2x128xf32>
    %274 = arith.addf %273, %272 : vector<2x128xf32>
    %275 = arith.divf %273, %274 : vector<2x128xf32>
    %276 = math.tanh %270 : vector<2x128xf32>
    %277 = vector.extract_strided_slice %275 {offsets = [0, 0], sizes = [2, 32], strides = [1, 1]} : vector<2x128xf32> to vector<2x32xf32>
    %278 = vector.extract_strided_slice %275 {offsets = [0, 32], sizes = [2, 32], strides = [1, 1]} : vector<2x128xf32> to vector<2x32xf32>
    %279 = vector.extract_strided_slice %276 {offsets = [0, 64], sizes = [2, 32], strides = [1, 1]} : vector<2x128xf32> to vector<2x32xf32>
    %280 = vector.extract_strided_slice %275 {offsets = [0, 96], sizes = [2, 32], strides = [1, 1]} : vector<2x128xf32> to vector<2x32xf32>
    %281 = arith.mulf %278, %247 : vector<2x32xf32>
    %282 = arith.mulf %277, %279 : vector<2x32xf32>
    %283 = arith.addf %281, %282 : vector<2x32xf32>
    %284 = math.tanh %283 : vector<2x32xf32>
    %285 = arith.mulf %280, %284 : vector<2x32xf32>
    %286 = tpu.concatenate %285, %267 in 1 : vector<2x32xf32>, vector<2x32xf32> -> vector<2x64xf32>
    %cst_45 = arith.constant dense<0.000000e+00> : vector<2x128xf32>
    %287 = tpu.matmul %286, %1, %cst_45 {dimension_numbers = #tpu.dot_dimension_numbers<[1], [0], [0], [1], [0, 0, 1, 1], [], []>} : vector<2x64xf32>, vector<64x128xf32>, vector<2x128xf32> -> vector<2x128xf32>
    %288 = arith.addf %287, %11 : vector<2x128xf32>
    %289 = arith.negf %288 : vector<2x128xf32>
    %290 = math.exp %289 : vector<2x128xf32>
    %cst_46 = arith.constant 1.000000e+00 : f32
    %291 = vector.broadcast %cst_46 : f32 to vector<2x128xf32>
    %292 = arith.addf %291, %290 : vector<2x128xf32>
    %293 = arith.divf %291, %292 : vector<2x128xf32>
    %294 = math.tanh %288 : vector<2x128xf32>
    %295 = vector.extract_strided_slice %293 {offsets = [0, 0], sizes = [2, 32], strides = [1, 1]} : vector<2x128xf32> to vector<2x32xf32>
    %296 = vector.extract_strided_slice %293 {offsets = [0, 32], sizes = [2, 32], strides = [1, 1]} : vector<2x128xf32> to vector<2x32xf32>
    %297 = vector.extract_strided_slice %294 {offsets = [0, 64], sizes = [2, 32], strides = [1, 1]} : vector<2x128xf32> to vector<2x32xf32>
    %298 = vector.extract_strided_slice %293 {offsets = [0, 96], sizes = [2, 32], strides = [1, 1]} : vector<2x128xf32> to vector<2x32xf32>
    %299 = arith.mulf %296, %265 : vector<2x32xf32>
    %300 = arith.mulf %295, %297 : vector<2x32xf32>
    %301 = arith.addf %299, %300 : vector<2x32xf32>
    %302 = math.tanh %301 : vector<2x32xf32>
    %303 = arith.mulf %298, %302 : vector<2x32xf32>
    %c0_47 = arith.constant 0 : index
    %c0_48 = arith.constant 0 : index
    %304 = vector.load %arg6[%c0_47, %c0_48] : memref<32x16xf32, #tpu.memory_space<vmem>>, vector<32x16xf32>
    %cst_49 = arith.constant dense<0.000000e+00> : vector<2x16xf32>
    %305 = tpu.matmul %303, %304, %cst_49 {dimension_numbers = #tpu.dot_dimension_numbers<[1], [0], [0], [1], [0, 0, 1, 1], [], []>} : vector<2x32xf32>, vector<32x16xf32>, vector<2x16xf32> -> vector<2x16xf32>
    %c0_50 = arith.constant 0 : index
    %c0_51 = arith.constant 0 : index
    %306 = vector.load %arg7[%c0_50, %c0_51] : memref<1x16xf32, #tpu.memory_space<vmem>>, vector<1x16xf32>
    %307 = vector.shape_cast %306 : vector<1x16xf32> to vector<1x16xf32>
    %308 = vector.broadcast %307 : vector<1x16xf32> to vector<2x16xf32>
    %309 = arith.addf %305, %308 : vector<2x16xf32>
    %c0_52 = arith.constant 0 : index
    %c0_53 = arith.constant 0 : index
    %310 = vector.load %arg8[%c0_52, %c0_53] : memref<2x16xf32, #tpu.memory_space<vmem>>, vector<2x16xf32>
    tpu.vector_store %arg8[%c0_52, %c0_53], %309 {strides = array<i32>} : memref<2x16xf32, #tpu.memory_space<vmem>>, vector<2x16xf32>,
    return
  }
}

</mosaic_0001>

<bundles_post_ra>
// kernel: tpu_custom_call.1
= control target key start
LH: loop header
LB: loop body
LE: loop exit
PB: predicated region body
PF: predicated region fallthrough
CT: control target
= control target key end

     0   :  { %13 = vsyncpa [#allocation3], 0  ;;  %s3144_s0 = inlined_call_operand.vmem [shape: f32[16,4], index: 0, kind: input, shape index: {}]   ;;  %s3145_s1 = inlined_call_operand.vmem [shape: f32[4,128], index: 1, kind: input, shape index: {}]   ;;  %s3146_s2 = inlined_call_operand.hbm [shape: f32[32,128], index: 2, kind: input, shape index: {}]   ;;  %s3147_s3 = inlined_call_operand.vmem [shape: f32[1,128], index: 3, kind: input, shape index: {}]   ;;  %s3148_s4 = inlined_call_operand.vmem [shape: f32[64,128], index: 4, kind: input, shape index: {}]   ;;  %s3149_s5 = inlined_call_operand.vmem [shape: f32[1,128], index: 5, kind: input, shape index: {}]   ;;  %s3150_s6 = inlined_call_operand.vmem [shape: f32[32,16], index: 6, kind: input, shape index: {}]   ;;  %s3151_s7 = inlined_call_operand.vmem [shape: f32[1,16], index: 7, kind: input, shape index: {}]   ;;  %s3152_s8 = inlined_call_operand.hbm [shape: f32[2,16], index: 8, kind: output, shape index: {}]  }
   0x1   :  { %14 = vsyncpa [#allocation4], 0  ;;  %s2700_s27 = smov [#allocation2]   ;;  %s2652_s9 = scalar_lea.hbm %s3146_s2, 512 }
   0x2   :  { %s24_s28 = sshll.u32 %s2700_s27, 4  ;;  %p2653_p0 = scmp.ne.s32.totalorder %s3146_s2, %s2652_s9  ;;  %s25_s28 = int_to_ptr.vmem [resolvable:$true] %s24_s28 }
   0x3   :  { %p2656_p1 = scmp.lt.u32.totalorder %s2652_s9, %s3146_s2 }
   0x5   :  { %p2658_p2 = pnand %p2656_p1, %p2653_p0 }
   0x7   :  { %2661 = shalt.err (!%p2658_p2)
}
   0x8   :  { %s2662_s14 = scalar_lea.vmem %s25_s28, 512  ;;  %p2667_p4 = scmp.lt.s32.totalorder %s25_s28, %s25_s28 }
   0x9   :  { %p2663_p3 = scmp.ne.s32.totalorder %s25_s28, %s2662_s14  ;;  %p2668_p5 = scmp.lt.s32.totalorder %s2662_s14, %s2662_s14 }
   0xb   :  { %p2669_p6 = por %p2668_p5, %p2667_p4 }
   0xd   :  { %p2670_p7 = pnand %p2669_p6, %p2663_p3 }
   0xf   :  { %2673 = shalt.err (!%p2670_p7)
}
  0x10   :  { %s2701_s15 = smov 128   ;;  %s2702_s16 = smov 8  }
  0x11   :  { %30 = dma.hbm_to_vmem [thread:$0]  %s3146_s2, 512, %s25_s28, [#allocation3], %s2701_s15, %s2701_s15, %s2702_s16  }
  0x12   :  { %2696 = dma.done.wait [#allocation3], 512  }
  0x13   :  { %2697 = vsyncadd [#allocation3], 4294966784  ;;  %v2703_v0 = vmov 0.0|0.0   ;;  %vm2704_vm0 = vmmov 0   ;;  %v2705_v1 = vmov 0.0   ;;  %vm73_vm1 = vcmask 1043456  }
  0x14   :  { %2365 = vmatprep.subr.bf16.mxu1 %v2703_v0  ;;  %2122 = vmatprep.mubr.msk.f32.mxu1 %vm2704_vm0, %v2705_v1  ;;  %vm66_vm2 = vcmask 31744   ;;  %v44_v2 = vld [vmem:[#allocation2] sm:$0xff]  ;;  %v45_v3 = vld [vmem:[#allocation2 + $0x8] sm:$0xff]  ;;  %v58_v4 = vld [vmem:[%s3145_s1] sm:$0xf]  ;;  %s2706_s24 = smov 64  }
  0x15   :  { %v2772_v5 = vpack.c.bf16 %v45_v3, %v44_v2  ;;  %2109 = vmatprep.subr.msk.mxu0 %vm73_vm1, %v58_v4  ;;  %v56_v6 = vld [vmem:[%s3144_s0] sm:$0xff]  ;;  %v57_v7 = vld [vmem:[%s3144_s0 + $0x8] sm:$0xff]  ;;  %v50_v31 = vld [vmem:[%s3148_s4 + $0x10] sm:$0xff]  ;;  %vm159_vm3 = vcmask 261120   ;;  %vm263_vm4 = vcmask 523264   ;;  %vm1934_vm5 = vcmask 123904  }
  0x16   :  { %v46_v8 = vld [vmem:[#allocation2 + $0x10] sm:$0xff]  ;;  %2110 = vmatpush3.msk.msra.mxu0 %vm73_vm1, %v58_v4  ;;  %2111 = vmatprep.mubr.msk.f32.mxu0 %vm66_vm2, %v56_v6  ;;  %v47_v9 = vld [vmem:[#allocation2 + $0x18] sm:$0xff]  ;;  %v51_v33 = vld [vmem:[%s3148_s4 + $0x18] sm:$0xff] }
  0x17   :  { %2367 = vmatpush3.bf16.msra.mxu1 %v2772_v5  ;;  %2112 = vmatmul.mubr.msk.f32.vlgmr.msra.gmra.mrb[0].mxu0 %vm66_vm2, %v57_v7  ;;  %v2781_v10 = vpack.c.bf16 %v47_v9, %v46_v8  ;;  %v1951_v11 = vld [vmem:[%s3147_s3] ss:$0 sm:$0xff]  ;;  %s2707_s3 = smov 32   ;;  %v49_v30 = vld [vmem:[%s3148_s4 + $0x8] sm:$0xff]  ;;  %v2824_v34 = vpack.c.bf16 %v51_v33, %v50_v31  ;;  %v54_v38 = vld [vmem:[%s3148_s4 + $0x30] sm:$0xff] }
  0x18   :  { %2368 = vmatprep.subr.bf16.mxu1 %v2703_v0  ;;  %2371 = vmatprep.subr.bf16.mxu0 %v2703_v0  ;;  %v48_v29 = vld [vmem:[%s3148_s4] sm:$0xff]  ;;  %v53_v36 = vld [vmem:[%s3148_s4 + $0x28] sm:$0xff]  ;;  %v55_v39 = vld [vmem:[%s3148_s4 + $0x38] sm:$0xff] }
  0x19   :  { %2141 = vmatprep.mubr.msk.f32.mxu0 %vm2704_vm0, %v2705_v1  ;;  %v2818_v32 = vpack.c.bf16 %v49_v30, %v48_v29  ;;  %v52_v35 = vld [vmem:[%s3148_s4 + $0x20] sm:$0xff]  ;;  %v2845_v41 = vpack.c.bf16 %v55_v39, %v54_v38 }
  0x1a   :  { %v2834_v37 = vpack.c.bf16 %v53_v36, %v52_v35  ;;  %v2873_v46 = vld [vmem:[%s3149_s5] ss:$0 sm:$0xff] }
  0x1b   :  { %2370 = vmatpush3.bf16.msra.mxu1 %v2781_v10  ;;  %2373 = vmatpush3.bf16.msra.mxu0 %v2818_v32 }
  0x1c   :  { %2383 = vmatprep.subr.bf16.mxu1 %v2703_v0  ;;  %2374 = vmatprep.subr.bf16.mxu0 %v2703_v0 }
  0x1e   :  { %2123 = vmatmul.mubr.f32.vlgmr.msra.gmra.mrb[0].mxu1 %v2705_v1 }
  0x1f   :  { %2385 = vmatpush3.bf16.msra.mxu1 %v2772_v5  ;;  %2152 = vmatprep.mubr.msk.f32.mxu1 %vm2704_vm0, %v2705_v1 }
  0x20   :  { %2386 = vmatprep.subr.bf16.mxu1 %v2703_v0  ;;  %2376 = vmatpush3.bf16.msra.mxu0 %v2824_v34 }
  0x21   :  { %2377 = vmatprep.subr.bf16.mxu0 %v2703_v0 }
  0x23   :  { %2388 = vmatpush3.bf16.msra.mxu1 %v2781_v10 }
  0x24   :  { %2389 = vmatprep.subr.bf16.mxu1 %v2703_v0  ;;  %2379 = vmatpush3.bf16.msra.mxu0 %v2834_v37 }
  0x25   :  { %2380 = vmatprep.subr.bf16.mxu0 %v2703_v0 }
  0x28   :  { %2382 = vmatpush3.bf16.msra.mxu0 %v2845_v41 }
  0x29   :  { %2401 = vmatprep.subr.bf16.mxu0 %v2703_v0 }
  0xea   :  { %v2113_v12 = vpop.f32.mrb[0].mxu0 }
  0xeb   :  { %v2799_v13 = vadd.f32 %v2113_v12, %v1951_v11  ;;  %v143_v14 = vpop.f32.mrb[1].mxu0 }
  0xec   :  { %v2801_v15 = vadd.f32 %v1951_v11, %v143_v14 }
  0xf1   :  { %v229_v16 = vpop.f32.mrb[0].mxu1 }
  0xf2   :  { %v233_v17 = vadd.f32 %v229_v16, %v2801_v15  ;;  %v2124_v18 = vpop.f32.mrb[1].mxu1 }
  0xf4   :  { %2524 = vtanh.f32 %v233_v17  ;;  %v1956_v20 = vmul.f32 -1.442695, %v233_v17 }
  0xf6   :  { %2526 = vpow2.f32 %v1956_v20 }
  0xfe   :  { %v2525_v19 = vpop.eup %2524 }
  0xff   :  { %243 = vrot.lane.b32.xlu0 %v2525_v19, %s2706_s24 }
 0x100   :  { %v2527_v21 = vpop.eup %2526 }
 0x101   :  { %v237_v22 = vadd.f32 1.0, %v2527_v21 }
 0x103   :  { %2528 = vrcp.f32 %v237_v22 }
 0x10d   :  { %v2529_v23 = vpop.eup %2528 }
 0x10e   :  { %v241_v26 = vmul.f32 0.0, %v2529_v23 }
 0x171   :  { %v244_v24 = vpop.permute.xlu0 %243 }
 0x172   :  { %v246_v25 = vmul.f32 %v2529_v23, %v244_v24 }
 0x174   :  { %248 = vrot.lane.b32.xlu0 %v246_v25, %s2707_s3 }
 0x1e6   :  { %v249_v27 = vpop.permute.xlu0 %248 }
 0x1e7   :  { %v2806_v28 = vadd.f32 %v249_v27, %v241_v26 }
 0x1e9   :  { %2530 = vtanh.f32 %v2806_v28  ;;  %v445_v7 = vrot.slane %v2806_v28, 6 }
 0x1f3   :  { %v2531_v40 = vpop.eup %2530 }
 0x1f4   :  { %254 = vrot.lane.b32.xlu1 %v2531_v40, %s2706_s24 }
 0x266   :  { %v255_v42 = vpop.permute.xlu1 %254 }
 0x267   :  { %v257_v43 = vmul.f32 %v2529_v23, %v255_v42 }
 0x269   :  { %259 = vrot.lane.b32.xlu1 %v257_v43, %s2707_s3 }
 0x2db   :  { %v260_v44 = vpop.permute.xlu1 %259 }
 0x2dc   :  { %v262_v45 = vsel %vm159_vm3, %v260_v44, 0.0  ;;  %2153 = vmatmul.mubr.msk.f32.vlgmr.msra.gmra.mrb[2].mxu1 %vm159_vm3, %v260_v44 }
 0x2dd   :  { %2142 = vmatmul.mubr.msk.f32.vlgmr.msra.gmra.mrb[2].mxu0 %vm263_vm4, %v262_v45  ;;  %2391 = vmatpush3.bf16.msra.mxu1 %v2818_v32 }
 0x2de   :  { %2392 = vmatprep.subr.bf16.mxu1 %v2703_v0  ;;  %2403 = vmatpush3.bf16.msra.mxu0 %v2772_v5 }
 0x2df   :  { %2404 = vmatprep.subr.bf16.mxu0 %v2703_v0  ;;  %2171 = vmatprep.mubr.msk.f32.mxu1 %vm2704_vm0, %v2705_v1 }
 0x2e0   :  { %2182 = vmatprep.mubr.msk.f32.mxu0 %vm2704_vm0, %v2705_v1 }
 0x2e1   :  { %2394 = vmatpush3.bf16.msra.mxu1 %v2824_v34 }
 0x2e2   :  { %2395 = vmatprep.subr.bf16.mxu1 %v2703_v0  ;;  %2406 = vmatpush3.bf16.msra.mxu0 %v2781_v10 }
 0x2e3   :  { %2407 = vmatprep.subr.bf16.mxu0 %v2703_v0 }
 0x2e5   :  { %2397 = vmatpush3.bf16.msra.mxu1 %v2834_v37 }
 0x2e6   :  { %2398 = vmatprep.subr.bf16.mxu1 %v2703_v0 }
 0x2e9   :  { %2400 = vmatpush3.bf16.msra.mxu1 %v2845_v41 }
 0x2ea   :  { %2419 = vmatprep.subr.bf16.mxu1 %v2703_v0 }
 0x3af   :  { %v429_v47 = vpop.f32.mrb[2].mxu1 }
 0x3b0   :  { %v434_v48 = vrot.slane %v429_v47, 6  ;;  %v333_v49 = vpop.f32.mrb[2].mxu0  ;;  %v2154_v50 = vpop.f32.mrb[3].mxu1 }
 0x3b1   :  { %v334_v51 = vadd.f32 %v2873_v46, %v333_v49  ;;  %v2143_v52 = vpop.f32.mrb[3].mxu0 }
 0x3b2   :  { %v436_v53 = vadd.f32 %v434_v48, %v2801_v15 }
 0x3b3   :  { %2532 = vtanh.f32 %v334_v51  ;;  %v1958_v56 = vmul.f32 -1.442695, %v334_v51 }
 0x3b4   :  { %2534 = vtanh.f32 %v436_v53  ;;  %v1960_v57 = vmul.f32 -1.442695, %v436_v53 }
 0x3b5   :  { %2536 = vpow2.f32 %v1958_v56 }
 0x3b6   :  { %2538 = vpow2.f32 %v1960_v57 }
 0x3bd   :  { %v2533_v54 = vpop.eup %2532 }
 0x3be   :  { %v2535_v55 = vpop.eup %2534  ;;  %346 = vrot.lane.b32.xlu0 %v2533_v54, %s2706_s24 }
 0x3bf   :  { %449 = vrot.lane.b32.xlu1 %v2535_v55, %s2706_s24  ;;  %v2537_v58 = vpop.eup %2536 }
 0x3c0   :  { %v2539_v59 = vpop.eup %2538  ;;  %v340_v60 = vadd.f32 1.0, %v2537_v58 }
 0x3c1   :  { %v440_v61 = vadd.f32 1.0, %v2539_v59 }
 0x3c2   :  { %2540 = vrcp.f32 %v340_v60 }
 0x3c3   :  { %2542 = vrcp.f32 %v440_v61 }
 0x3cc   :  { %v2541_v62 = vpop.eup %2540 }
 0x3cd   :  { %v2543_v2 = vpop.eup %2542  ;;  %v344_v8 = vmul.f32 0.0, %v2541_v62 }
 0x3ce   :  { %v447_v11 = vmul.f32 %v2543_v2, %v445_v7 }
 0x430   :  { %v347_v63 = vpop.permute.xlu0 %346 }
 0x431   :  { %v349_v3 = vmul.f32 %v2541_v62, %v347_v63  ;;  %v450_v4 = vpop.permute.xlu1 %449 }
 0x432   :  { %v452_v6 = vmul.f32 %v2543_v2, %v450_v4 }
 0x433   :  { %351 = vrot.lane.b32.xlu0 %v349_v3, %s2707_s3 }
 0x434   :  { %454 = vrot.lane.b32.xlu1 %v452_v6, %s2707_s3 }
 0x4a5   :  { %v352_v9 = vpop.permute.xlu0 %351 }
 0x4a6   :  { %v2882_v12 = vadd.f32 %v352_v9, %v344_v8  ;;  %v455_v14 = vpop.permute.xlu1 %454 }
 0x4a7   :  { %v2884_v16 = vadd.f32 %v455_v14, %v447_v11 }
 0x4a8   :  { %2544 = vtanh.f32 %v2882_v12 }
 0x4a9   :  { %2546 = vtanh.f32 %v2884_v16  ;;  %v659_v57 = vrot.slane %v2884_v16, 6 }
 0x4b2   :  { %v2545_v17 = vpop.eup %2544 }
 0x4b3   :  { %v2547_v18 = vpop.eup %2546  ;;  %357 = vrot.lane.b32.xlu0 %v2545_v17, %s2706_s24 }
 0x4b4   :  { %460 = vrot.lane.b32.xlu1 %v2547_v18, %s2706_s24 }
 0x525   :  { %v358_v19 = vpop.permute.xlu0 %357 }
 0x526   :  { %v360_v20 = vmul.f32 %v2541_v62, %v358_v19  ;;  %v461_v21 = vpop.permute.xlu1 %460 }
 0x527   :  { %v463_v22 = vmul.f32 %v2543_v2, %v461_v21 }
 0x528   :  { %v469_v23 = vrot.slane %v360_v20, 6 }
 0x529   :  { %465 = vrot.lane.b32.xlu0 %v463_v22, %s2707_s3  ;;  %v572_v24 = vrot.slane %v463_v22, 2 }
 0x52a   :  { %470 = vrot.lane.b32.xlu1 %v469_v23, %s2706_s24 }
 0x52d   :  { %573 = vrot.lane.b32.xlu0 %v572_v24, %s2707_s3 }
 0x59b   :  { %v466_v25 = vpop.permute.xlu0 %465 }
 0x59c   :  { %v471_v26 = vpop.permute.xlu1 %470 }
 0x59d   :  { %v473_v27 = vsel %vm159_vm3, %v466_v25, %v471_v26 }
 0x59e   :  { %v475_v28 = vrot.slane %v473_v27, 2 }
 0x59f   :  { %v574_v29 = vpop.permute.xlu0 %573 }
 0x5a0   :  { %2172 = vmatmul.mubr.msk.f32.vlgmr.msra.gmra.mrb[4].mxu1 %vm263_vm4, %v475_v28  ;;  %2183 = vmatmul.mubr.msk.f32.vlgmr.msra.gmra.mrb[4].mxu0 %vm159_vm3, %v574_v29 }
 0x5a1   :  { %2409 = vmatpush3.bf16.msra.mxu0 %v2818_v32  ;;  %2421 = vmatpush3.bf16.msra.mxu1 %v2772_v5 }
 0x5a2   :  { %2410 = vmatprep.subr.bf16.mxu0 %v2703_v0  ;;  %2422 = vmatprep.subr.bf16.mxu1 %v2703_v0 }
 0x5a3   :  { %2201 = vmatprep.mubr.msk.f32.mxu0 %vm2704_vm0, %v2705_v1  ;;  %2212 = vmatprep.mubr.msk.f32.mxu1 %vm2704_vm0, %v2705_v1 }
 0x5a5   :  { %2412 = vmatpush3.bf16.msra.mxu0 %v2824_v34  ;;  %2424 = vmatpush3.bf16.msra.mxu1 %v2781_v10 }
 0x5a6   :  { %2413 = vmatprep.subr.bf16.mxu0 %v2703_v0  ;;  %2425 = vmatprep.subr.bf16.mxu1 %v2703_v0 }
 0x5a9   :  { %2415 = vmatpush3.bf16.msra.mxu0 %v2834_v37 }
 0x5aa   :  { %2416 = vmatprep.subr.bf16.mxu0 %v2703_v0 }
 0x5ad   :  { %2418 = vmatpush3.bf16.msra.mxu0 %v2845_v41 }
 0x5ae   :  { %2437 = vmatprep.subr.bf16.mxu0 %v2703_v0 }
 0x673   :  { %v544_v30 = vpop.f32.mrb[4].mxu1  ;;  %v643_v31 = vpop.f32.mrb[4].mxu0 }
 0x674   :  { %v545_v33 = vadd.f32 %v2873_v46, %v544_v30  ;;  %v648_v35 = vrot.slane %v643_v31, 4  ;;  %v2173_v36 = vpop.f32.mrb[5].mxu1  ;;  %v2184_v38 = vpop.f32.mrb[5].mxu0 }
 0x676   :  { %2548 = vtanh.f32 %v545_v33  ;;  %v650_v39 = vadd.f32 %v648_v35, %v2801_v15  ;;  %v1962_v43 = vmul.f32 -1.442695, %v545_v33 }
 0x678   :  { %2550 = vtanh.f32 %v650_v39  ;;  %v1964_v44 = vmul.f32 -1.442695, %v650_v39 }
 0x679   :  { %2552 = vpow2.f32 %v1962_v43 }
 0x67a   :  { %2554 = vpow2.f32 %v1964_v44 }
 0x680   :  { %v2549_v40 = vpop.eup %2548 }
 0x681   :  { %557 = vrot.lane.b32.xlu1 %v2549_v40, %s2706_s24 }
 0x682   :  { %v2551_v42 = vpop.eup %2550 }
 0x683   :  { %663 = vrot.lane.b32.xlu0 %v2551_v42, %s2706_s24  ;;  %v2553_v45 = vpop.eup %2552 }
 0x684   :  { %v2555_v47 = vpop.eup %2554  ;;  %v551_v48 = vadd.f32 1.0, %v2553_v45 }
 0x685   :  { %v654_v49 = vadd.f32 1.0, %v2555_v47 }
 0x686   :  { %2556 = vrcp.f32 %v551_v48 }
 0x687   :  { %2558 = vrcp.f32 %v654_v49 }
 0x690   :  { %v2557_v50 = vpop.eup %2556 }
 0x691   :  { %v2559_v53 = vpop.eup %2558  ;;  %v555_v56 = vmul.f32 %v2557_v50, %v2882_v12 }
 0x692   :  { %v661_v60 = vmul.f32 %v2559_v53, %v659_v57 }
 0x6f3   :  { %v558_v51 = vpop.permute.xlu1 %557 }
 0x6f4   :  { %v560_v52 = vmul.f32 %v2557_v50, %v558_v51 }
 0x6f5   :  { %v664_v54 = vpop.permute.xlu0 %663 }
 0x6f6   :  { %562 = vrot.lane.b32.xlu1 %v560_v52, %s2707_s3  ;;  %v666_v55 = vmul.f32 %v2559_v53, %v664_v54 }
 0x6f8   :  { %668 = vrot.lane.b32.xlu0 %v666_v55, %s2707_s3 }
 0x768   :  { %v563_v58 = vpop.permute.xlu1 %562 }
 0x769   :  { %v2920_v59 = vadd.f32 %v563_v58, %v555_v56 }
 0x76a   :  { %v669_v61 = vpop.permute.xlu0 %668 }
 0x76b   :  { %2560 = vtanh.f32 %v2920_v59  ;;  %v2923_v62 = vadd.f32 %v669_v61, %v661_v60 }
 0x76d   :  { %2562 = vtanh.f32 %v2923_v62  ;;  %v873_v43 = vrot.slane %v2923_v62, 6 }
 0x775   :  { %v2561_v63 = vpop.eup %2560 }
 0x776   :  { %568 = vrot.lane.b32.xlu1 %v2561_v63, %s2706_s24 }
 0x777   :  { %v2563_v2 = vpop.eup %2562 }
 0x778   :  { %674 = vrot.lane.b32.xlu0 %v2563_v2, %s2706_s24 }
 0x7e8   :  { %v569_v3 = vpop.permute.xlu1 %568 }
 0x7e9   :  { %v571_v4 = vmul.f32 %v2557_v50, %v569_v3 }
 0x7ea   :  { %v675_v7 = vpop.permute.xlu0 %674 }
 0x7eb   :  { %v683_v6 = vrot.slane %v571_v4, 4  ;;  %v677_v8 = vmul.f32 %v2559_v53, %v675_v7 }
 0x7ed   :  { %684 = vrot.lane.b32.xlu0 %v683_v6, %s2706_s24  ;;  %679 = vrot.lane.b32.xlu1 %v677_v8, %s2707_s3  ;;  %v786_v9 = vrot.slane %v677_v8, 4 }
 0x7f1   :  { %787 = vrot.lane.b32.xlu1 %v786_v9, %s2707_s3 }
 0x85f   :  { %v685_v11 = vpop.permute.xlu0 %684  ;;  %v680_v12 = vpop.permute.xlu1 %679 }
 0x860   :  { %v687_v14 = vsel %vm159_vm3, %v680_v12, %v685_v11 }
 0x861   :  { %v689_v16 = vrot.slane %v687_v14, 4 }
 0x863   :  { %2202 = vmatmul.mubr.msk.f32.vlgmr.msra.gmra.mrb[6].mxu0 %vm263_vm4, %v689_v16  ;;  %v788_v17 = vpop.permute.xlu1 %787 }
 0x864   :  { %2213 = vmatmul.mubr.msk.f32.vlgmr.msra.gmra.mrb[6].mxu1 %vm159_vm3, %v788_v17  ;;  %2439 = vmatpush3.bf16.msra.mxu0 %v2772_v5 }
 0x865   :  { %2427 = vmatpush3.bf16.msra.mxu1 %v2818_v32  ;;  %2440 = vmatprep.subr.bf16.mxu0 %v2703_v0 }
 0x866   :  { %2428 = vmatprep.subr.bf16.mxu1 %v2703_v0  ;;  %2231 = vmatprep.mubr.msk.f32.mxu1 %vm2704_vm0, %v2705_v1 }
 0x867   :  { %2242 = vmatprep.mubr.msk.f32.mxu0 %vm2704_vm0, %v2705_v1 }
 0x868   :  { %2442 = vmatpush3.bf16.msra.mxu0 %v2781_v10 }
 0x869   :  { %2430 = vmatpush3.bf16.msra.mxu1 %v2824_v34  ;;  %2443 = vmatprep.subr.bf16.mxu0 %v2703_v0 }
 0x86a   :  { %2431 = vmatprep.subr.bf16.mxu1 %v2703_v0 }
 0x86d   :  { %2433 = vmatpush3.bf16.msra.mxu1 %v2834_v37 }
 0x86e   :  { %2434 = vmatprep.subr.bf16.mxu1 %v2703_v0 }
 0x871   :  { %2436 = vmatpush3.bf16.msra.mxu1 %v2845_v41 }
 0x872   :  { %2455 = vmatprep.subr.bf16.mxu1 %v2703_v0 }
 0x936   :  { %v758_v18 = vpop.f32.mrb[6].mxu0 }
 0x937   :  { %v759_v19 = vadd.f32 %v2873_v46, %v758_v18  ;;  %v2203_v20 = vpop.f32.mrb[7].mxu0  ;;  %v857_v21 = vpop.f32.mrb[6].mxu1 }
 0x938   :  { %v862_v22 = vrot.slane %v857_v21, 2  ;;  %v2214_v23 = vpop.f32.mrb[7].mxu1 }
 0x939   :  { %2564 = vtanh.f32 %v759_v19  ;;  %v1966_v27 = vmul.f32 -1.442695, %v759_v19 }
 0x93a   :  { %v864_v24 = vadd.f32 %v862_v22, %v2801_v15 }
 0x93c   :  { %2566 = vtanh.f32 %v864_v24  ;;  %v1968_v28 = vmul.f32 -1.442695, %v864_v24 }
 0x93d   :  { %2568 = vpow2.f32 %v1966_v27 }
 0x93e   :  { %2570 = vpow2.f32 %v1968_v28 }
 0x943   :  { %v2565_v25 = vpop.eup %2564 }
 0x944   :  { %771 = vrot.lane.b32.xlu0 %v2565_v25, %s2706_s24 }
 0x946   :  { %v2567_v26 = vpop.eup %2566 }
 0x947   :  { %877 = vrot.lane.b32.xlu1 %v2567_v26, %s2706_s24  ;;  %v2569_v29 = vpop.eup %2568 }
 0x948   :  { %v2571_v30 = vpop.eup %2570  ;;  %v765_v31 = vadd.f32 1.0, %v2569_v29 }
 0x949   :  { %v868_v33 = vadd.f32 1.0, %v2571_v30 }
 0x94a   :  { %2572 = vrcp.f32 %v765_v31 }
 0x94b   :  { %2574 = vrcp.f32 %v868_v33 }
 0x954   :  { %v2573_v35 = vpop.eup %2572 }
 0x955   :  { %v2575_v38 = vpop.eup %2574  ;;  %v769_v42 = vmul.f32 %v2573_v35, %v2920_v59 }
 0x956   :  { %v875_v47 = vmul.f32 %v2575_v38, %v873_v43 }
 0x9b6   :  { %v772_v36 = vpop.permute.xlu0 %771 }
 0x9b7   :  { %v774_v15 = vmul.f32 %v2573_v35, %v772_v36 }
 0x9b9   :  { %776 = vrot.lane.b32.xlu0 %v774_v15, %s2707_s3  ;;  %v878_v39 = vpop.permute.xlu1 %877 }
 0x9ba   :  { %v880_v40 = vmul.f32 %v2575_v38, %v878_v39 }
 0x9bc   :  { %882 = vrot.lane.b32.xlu1 %v880_v40, %s2707_s3 }
 0xa2b   :  { %v777_v44 = vpop.permute.xlu0 %776 }
 0xa2c   :  { %v2958_v45 = vadd.f32 %v777_v44, %v769_v42 }
 0xa2e   :  { %2576 = vtanh.f32 %v2958_v45  ;;  %v883_v48 = vpop.permute.xlu1 %882 }
 0xa2f   :  { %v2961_v49 = vadd.f32 %v883_v48, %v875_v47 }
 0xa31   :  { %2578 = vtanh.f32 %v2961_v49  ;;  %v1084_v25 = vrot.slane %v2961_v49, 6 }
 0xa38   :  { %v2577_v50 = vpop.eup %2576 }
 0xa39   :  { %782 = vrot.lane.b32.xlu0 %v2577_v50, %s2706_s24 }
 0xa3b   :  { %v2579_v51 = vpop.eup %2578 }
 0xa3c   :  { %888 = vrot.lane.b32.xlu1 %v2579_v51, %s2706_s24 }
 0xaab   :  { %v783_v52 = vpop.permute.xlu0 %782 }
 0xaac   :  { %v785_v53 = vmul.f32 %v2573_v35, %v783_v52 }
 0xaae   :  { %v897_v54 = vrot.slane %v785_v53, 2  ;;  %v889_v55 = vpop.permute.xlu1 %888 }
 0xaaf   :  { %v891_v56 = vmul.f32 %v2575_v38, %v889_v55 }
 0xab0   :  { %898 = vrot.lane.b32.xlu1 %v897_v54, %s2706_s24 }
 0xab1   :  { %893 = vrot.lane.b32.xlu0 %v891_v56, %s2707_s3  ;;  %v1000_v57 = vrot.slane %v891_v56, 6 }
 0xab5   :  { %1001 = vrot.lane.b32.xlu0 %v1000_v57, %s2707_s3 }
 0xb22   :  { %v899_v58 = vpop.permute.xlu1 %898 }
 0xb23   :  { %v894_v59 = vpop.permute.xlu0 %893 }
 0xb24   :  { %v901_v60 = vsel %vm159_vm3, %v894_v59, %v899_v58 }
 0xb25   :  { %v903_v61 = vrot.slane %v901_v60, 6 }
 0xb27   :  { %v1002_v62 = vpop.permute.xlu0 %1001  ;;  %2232 = vmatmul.mubr.msk.f32.vlgmr.msra.gmra.mrb[8].mxu1 %vm263_vm4, %v903_v61 }
 0xb28   :  { %2243 = vmatmul.mubr.msk.f32.vlgmr.msra.gmra.mrb[8].mxu0 %vm159_vm3, %v1002_v62  ;;  %2457 = vmatpush3.bf16.msra.mxu1 %v2772_v5 }
 0xb29   :  { %2445 = vmatpush3.bf16.msra.mxu0 %v2818_v32  ;;  %2458 = vmatprep.subr.bf16.mxu1 %v2703_v0 }
 0xb2a   :  { %2446 = vmatprep.subr.bf16.mxu0 %v2703_v0  ;;  %2272 = vmatprep.mubr.msk.f32.mxu1 %vm2704_vm0, %v2705_v1 }
 0xb2b   :  { %2261 = vmatprep.mubr.msk.f32.mxu0 %vm2704_vm0, %v2705_v1 }
 0xb2c   :  { %2460 = vmatpush3.bf16.msra.mxu1 %v2781_v10 }
 0xb2d   :  { %2448 = vmatpush3.bf16.msra.mxu0 %v2824_v34  ;;  %2461 = vmatprep.subr.bf16.mxu1 %v2703_v0 }
 0xb2e   :  { %2449 = vmatprep.subr.bf16.mxu0 %v2703_v0 }
 0xb31   :  { %2451 = vmatpush3.bf16.msra.mxu0 %v2834_v37 }
 0xb32   :  { %2452 = vmatprep.subr.bf16.mxu0 %v2703_v0 }
 0xb35   :  { %2454 = vmatpush3.bf16.msra.mxu0 %v2845_v41 }
 0xb36   :  { %2473 = vmatprep.subr.bf16.mxu0 %v2703_v0 }
 0xbfa   :  { %v972_v63 = vpop.f32.mrb[8].mxu1 }
 0xbfb   :  { %v973_v2 = vadd.f32 %v2873_v46, %v972_v63  ;;  %v2233_v3 = vpop.f32.mrb[9].mxu1  ;;  %v1071_v4 = vpop.f32.mrb[8].mxu0 }
 0xbfc   :  { %v1075_v6 = vadd.f32 %v1071_v4, %v2799_v13  ;;  %v2244_v7 = vpop.f32.mrb[9].mxu0 }
 0xbfd   :  { %2580 = vtanh.f32 %v973_v2  ;;  %v1970_v11 = vmul.f32 -1.442695, %v973_v2 }
 0xbfe   :  { %2582 = vtanh.f32 %v1075_v6  ;;  %v1972_v12 = vmul.f32 -1.442695, %v1075_v6 }
 0xbff   :  { %2584 = vpow2.f32 %v1970_v11 }
 0xc00   :  { %2586 = vpow2.f32 %v1972_v12 }
 0xc07   :  { %v2581_v8 = vpop.eup %2580 }
 0xc08   :  { %v2583_v9 = vpop.eup %2582  ;;  %985 = vrot.lane.b32.xlu1 %v2581_v8, %s2706_s24 }
 0xc09   :  { %1088 = vrot.lane.b32.xlu0 %v2583_v9, %s2706_s24  ;;  %v2585_v14 = vpop.eup %2584 }
 0xc0a   :  { %v2587_v16 = vpop.eup %2586  ;;  %v979_v17 = vadd.f32 1.0, %v2585_v14 }
 0xc0b   :  { %v1079_v18 = vadd.f32 1.0, %v2587_v16 }
 0xc0c   :  { %2588 = vrcp.f32 %v979_v17 }
 0xc0d   :  { %2590 = vrcp.f32 %v1079_v18 }
 0xc16   :  { %v2589_v19 = vpop.eup %2588 }
 0xc17   :  { %v2591_v21 = vpop.eup %2590  ;;  %v983_v26 = vmul.f32 %v2589_v19, %v2958_v45 }
 0xc18   :  { %v1086_v28 = vmul.f32 %v2591_v21, %v1084_v25 }
 0xc7a   :  { %v986_v20 = vpop.permute.xlu1 %985 }
 0xc7b   :  { %v988_v22 = vmul.f32 %v2589_v19, %v986_v20  ;;  %v1089_v23 = vpop.permute.xlu0 %1088 }
 0xc7c   :  { %v1091_v24 = vmul.f32 %v2591_v21, %v1089_v23 }
 0xc7d   :  { %990 = vrot.lane.b32.xlu1 %v988_v22, %s2707_s3 }
 0xc7e   :  { %1093 = vrot.lane.b32.xlu0 %v1091_v24, %s2707_s3 }
 0xcef   :  { %v991_v27 = vpop.permute.xlu1 %990 }
 0xcf0   :  { %v2996_v29 = vadd.f32 %v991_v27, %v983_v26  ;;  %v1094_v30 = vpop.permute.xlu0 %1093 }
 0xcf1   :  { %v2998_v31 = vadd.f32 %v1094_v30, %v1086_v28 }
 0xcf2   :  { %2592 = vtanh.f32 %v2996_v29 }
 0xcf3   :  { %2594 = vtanh.f32 %v2998_v31  ;;  %v1293_v4 = vrot.slane %v2998_v31, 6 }
 0xcfc   :  { %v2593_v33 = vpop.eup %2592 }
 0xcfd   :  { %v2595_v35 = vpop.eup %2594  ;;  %996 = vrot.lane.b32.xlu1 %v2593_v33, %s2706_s24 }
 0xcfe   :  { %1099 = vrot.lane.b32.xlu0 %v2595_v35, %s2706_s24 }
 0xd6f   :  { %v997_v36 = vpop.permute.xlu1 %996 }
 0xd70   :  { %v999_v15 = vmul.f32 %v2589_v19, %v997_v36  ;;  %v1100_v38 = vpop.permute.xlu0 %1099 }
 0xd71   :  { %v1102_v39 = vmul.f32 %v2591_v21, %v1100_v38 }
 0xd72   :  { %1108 = vrot.lane.b32.xlu0 %v999_v15, %s2706_s24 }
 0xd73   :  { %1104 = vrot.lane.b32.xlu1 %v1102_v39, %s2707_s3 }
 0xde4   :  { %v1109_v40 = vpop.permute.xlu0 %1108 }
 0xde5   :  { %v1105_v42 = vpop.permute.xlu1 %1104 }
 0xde6   :  { %v1111_v43 = vsel %vm159_vm3, %v1105_v42, %v1109_v40  ;;  %2273 = vmatmul.mubr.msk.f32.vlgmr.msra.gmra.mrb[10].mxu1 %vm159_vm3, %v1105_v42 }
 0xde7   :  { %2262 = vmatmul.mubr.msk.f32.vlgmr.msra.gmra.mrb[10].mxu0 %vm263_vm4, %v1111_v43  ;;  %2463 = vmatpush3.bf16.msra.mxu1 %v2818_v32 }
 0xde8   :  { %2464 = vmatprep.subr.bf16.mxu1 %v2703_v0  ;;  %2475 = vmatpush3.bf16.msra.mxu0 %v2772_v5 }
 0xde9   :  { %2476 = vmatprep.subr.bf16.mxu0 %v2703_v0  ;;  %2291 = vmatprep.mubr.msk.f32.mxu1 %vm2704_vm0, %v2705_v1 }
 0xdea   :  { %2302 = vmatprep.mubr.msk.f32.mxu0 %vm2704_vm0, %v2705_v1 }
 0xdeb   :  { %2466 = vmatpush3.bf16.msra.mxu1 %v2824_v34 }
 0xdec   :  { %2467 = vmatprep.subr.bf16.mxu1 %v2703_v0  ;;  %2478 = vmatpush3.bf16.msra.mxu0 %v2781_v10 }
 0xded   :  { %2479 = vmatprep.subr.bf16.mxu0 %v2703_v0 }
 0xdef   :  { %2469 = vmatpush3.bf16.msra.mxu1 %v2834_v37 }
 0xdf0   :  { %2470 = vmatprep.subr.bf16.mxu1 %v2703_v0 }
 0xdf3   :  { %2472 = vmatpush3.bf16.msra.mxu1 %v2845_v41 }
 0xdf4   :  { %2491 = vmatprep.subr.bf16.mxu1 %v2703_v0 }
 0xeb9   :  { %v1277_v44 = vpop.f32.mrb[10].mxu1 }
 0xeba   :  { %v1282_v45 = vrot.slane %v1277_v44, 6  ;;  %v1181_v47 = vpop.f32.mrb[10].mxu0  ;;  %v2274_v48 = vpop.f32.mrb[11].mxu1 }
 0xebb   :  { %v1182_v49 = vadd.f32 %v2873_v46, %v1181_v47  ;;  %v2263_v50 = vpop.f32.mrb[11].mxu0 }
 0xebc   :  { %v1284_v51 = vadd.f32 %v1282_v45, %v2799_v13 }
 0xebd   :  { %2596 = vtanh.f32 %v1182_v49  ;;  %v1974_v54 = vmul.f32 -1.442695, %v1182_v49 }
 0xebe   :  { %2598 = vtanh.f32 %v1284_v51  ;;  %v1976_v55 = vmul.f32 -1.442695, %v1284_v51 }
 0xebf   :  { %2600 = vpow2.f32 %v1974_v54 }
 0xec0   :  { %2602 = vpow2.f32 %v1976_v55 }
 0xec7   :  { %v2597_v52 = vpop.eup %2596 }
 0xec8   :  { %v2599_v53 = vpop.eup %2598  ;;  %1194 = vrot.lane.b32.xlu1 %v2597_v52, %s2706_s24 }
 0xec9   :  { %1297 = vrot.lane.b32.xlu0 %v2599_v53, %s2706_s24  ;;  %v2601_v56 = vpop.eup %2600 }
 0xeca   :  { %v2603_v57 = vpop.eup %2602  ;;  %v1188_v58 = vadd.f32 1.0, %v2601_v56 }
 0xecb   :  { %v1288_v59 = vadd.f32 1.0, %v2603_v57 }
 0xecc   :  { %2604 = vrcp.f32 %v1188_v58 }
 0xecd   :  { %2606 = vrcp.f32 %v1288_v59 }
 0xed6   :  { %v2605_v60 = vpop.eup %2604 }
 0xed7   :  { %v2607_v62 = vpop.eup %2606  ;;  %v1192_v6 = vmul.f32 %v2605_v60, %v2996_v29 }
 0xed8   :  { %v1295_v8 = vmul.f32 %v2607_v62, %v1293_v4 }
 0xf3a   :  { %v1195_v61 = vpop.permute.xlu1 %1194 }
 0xf3b   :  { %v1197_v63 = vmul.f32 %v2605_v60, %v1195_v61  ;;  %v1298_v2 = vpop.permute.xlu0 %1297 }
 0xf3c   :  { %v1300_v3 = vmul.f32 %v2607_v62, %v1298_v2 }
 0xf3d   :  { %1199 = vrot.lane.b32.xlu1 %v1197_v63, %s2707_s3 }
 0xf3e   :  { %1302 = vrot.lane.b32.xlu0 %v1300_v3, %s2707_s3 }
 0xfaf   :  { %v1200_v7 = vpop.permute.xlu1 %1199 }
 0xfb0   :  { %v3033_v9 = vadd.f32 %v1200_v7, %v1192_v6  ;;  %v1303_v11 = vpop.permute.xlu0 %1302 }
 0xfb1   :  { %v3035_v12 = vadd.f32 %v1303_v11, %v1295_v8 }
 0xfb2   :  { %2608 = vtanh.f32 %v3033_v9 }
 0xfb3   :  { %2610 = vtanh.f32 %v3035_v12  ;;  %v1507_v52 = vrot.slane %v3035_v12, 6 }
 0xfbc   :  { %v2609_v14 = vpop.eup %2608 }
 0xfbd   :  { %v2611_v16 = vpop.eup %2610  ;;  %1205 = vrot.lane.b32.xlu1 %v2609_v14, %s2706_s24 }
 0xfbe   :  { %1308 = vrot.lane.b32.xlu0 %v2611_v16, %s2706_s24 }
0x102f   :  { %v1206_v17 = vpop.permute.xlu1 %1205 }
0x1030   :  { %v1208_v18 = vmul.f32 %v2605_v60, %v1206_v17  ;;  %v1309_v19 = vpop.permute.xlu0 %1308 }
0x1031   :  { %v1311_v20 = vmul.f32 %v2607_v62, %v1309_v19 }
0x1032   :  { %v1317_v21 = vrot.slane %v1208_v18, 6 }
0x1033   :  { %1313 = vrot.lane.b32.xlu1 %v1311_v20, %s2707_s3  ;;  %v1420_v22 = vrot.slane %v1311_v20, 2 }
0x1034   :  { %1318 = vrot.lane.b32.xlu0 %v1317_v21, %s2706_s24 }
0x1037   :  { %1421 = vrot.lane.b32.xlu1 %v1420_v22, %s2707_s3 }
0x10a5   :  { %v1314_v23 = vpop.permute.xlu1 %1313 }
0x10a6   :  { %v1319_v24 = vpop.permute.xlu0 %1318 }
0x10a7   :  { %v1321_v25 = vsel %vm159_vm3, %v1314_v23, %v1319_v24 }
0x10a8   :  { %v1323_v26 = vrot.slane %v1321_v25, 2 }
0x10a9   :  { %v1422_v27 = vpop.permute.xlu1 %1421 }
0x10aa   :  { %2292 = vmatmul.mubr.msk.f32.vlgmr.msra.gmra.mrb[12].mxu1 %vm263_vm4, %v1323_v26  ;;  %2303 = vmatmul.mubr.msk.f32.vlgmr.msra.gmra.mrb[12].mxu0 %vm159_vm3, %v1422_v27 }
0x10ab   :  { %2481 = vmatpush3.bf16.msra.mxu0 %v2818_v32  ;;  %2493 = vmatpush3.bf16.msra.mxu1 %v2772_v5 }
0x10ac   :  { %2482 = vmatprep.subr.bf16.mxu0 %v2703_v0  ;;  %2494 = vmatprep.subr.bf16.mxu1 %v2703_v0 }
0x10ad   :  { %2321 = vmatprep.mubr.msk.f32.mxu0 %vm2704_vm0, %v2705_v1  ;;  %2332 = vmatprep.mubr.msk.f32.mxu1 %vm2704_vm0, %v2705_v1 }
0x10af   :  { %2484 = vmatpush3.bf16.msra.mxu0 %v2824_v34  ;;  %2496 = vmatpush3.bf16.msra.mxu1 %v2781_v10 }
0x10b0   :  { %2485 = vmatprep.subr.bf16.mxu0 %v2703_v0  ;;  %2497 = vmatprep.subr.bf16.mxu1 %v2703_v0 }
0x10b3   :  { %2487 = vmatpush3.bf16.msra.mxu0 %v2834_v37 }
0x10b4   :  { %2488 = vmatprep.subr.bf16.mxu0 %v2703_v0 }
0x10b7   :  { %2490 = vmatpush3.bf16.msra.mxu0 %v2845_v41 }
0x10b8   :  { %2509 = vmatprep.subr.bf16.mxu0 %v2703_v0 }
0x117d   :  { %v1392_v5 = vpop.f32.mrb[12].mxu1  ;;  %v1491_v28 = vpop.f32.mrb[12].mxu0 }
0x117e   :  { %v1393_v29 = vadd.f32 %v2873_v46, %v1392_v5  ;;  %v1496_v30 = vrot.slane %v1491_v28, 4  ;;  %v2293_v31 = vpop.f32.mrb[13].mxu1  ;;  %v2304_v33 = vpop.f32.mrb[13].mxu0 }
0x1180   :  { %2612 = vtanh.f32 %v1393_v29  ;;  %v1498_v10 = vadd.f32 %v1496_v30, %v2799_v13  ;;  %v1978_v15 = vmul.f32 -1.442695, %v1393_v29 }
0x1182   :  { %2614 = vtanh.f32 %v1498_v10  ;;  %v1980_v38 = vmul.f32 -1.442695, %v1498_v10 }
0x1183   :  { %2616 = vpow2.f32 %v1978_v15 }
0x1184   :  { %2618 = vpow2.f32 %v1980_v38 }
0x118a   :  { %v2613_v35 = vpop.eup %2612 }
0x118b   :  { %1405 = vrot.lane.b32.xlu0 %v2613_v35, %s2706_s24 }
0x118c   :  { %v2615_v36 = vpop.eup %2614 }
0x118d   :  { %1511 = vrot.lane.b32.xlu1 %v2615_v36, %s2706_s24  ;;  %v2617_v39 = vpop.eup %2616 }
0x118e   :  { %v2619_v40 = vpop.eup %2618  ;;  %v1399_v42 = vadd.f32 1.0, %v2617_v39 }
0x118f   :  { %v1502_v43 = vadd.f32 1.0, %v2619_v40 }
0x1190   :  { %2620 = vrcp.f32 %v1399_v42 }
0x1191   :  { %2622 = vrcp.f32 %v1502_v43 }
0x119a   :  { %v2621_v44 = vpop.eup %2620 }
0x119b   :  { %v2623_v48 = vpop.eup %2622  ;;  %v1403_v51 = vmul.f32 %v2621_v44, %v3033_v9 }
0x119c   :  { %v1509_v55 = vmul.f32 %v2623_v48, %v1507_v52 }
0x11fd   :  { %v1406_v45 = vpop.permute.xlu0 %1405 }
0x11fe   :  { %v1408_v47 = vmul.f32 %v2621_v44, %v1406_v45 }
0x11ff   :  { %v1512_v49 = vpop.permute.xlu1 %1511 }
0x1200   :  { %1410 = vrot.lane.b32.xlu0 %v1408_v47, %s2707_s3  ;;  %v1514_v50 = vmul.f32 %v2623_v48, %v1512_v49 }
0x1202   :  { %1516 = vrot.lane.b32.xlu1 %v1514_v50, %s2707_s3 }
0x1272   :  { %v1411_v53 = vpop.permute.xlu0 %1410 }
0x1273   :  { %v3071_v54 = vadd.f32 %v1411_v53, %v1403_v51 }
0x1274   :  { %v1517_v56 = vpop.permute.xlu1 %1516 }
0x1275   :  { %2624 = vtanh.f32 %v3071_v54  ;;  %v3074_v57 = vadd.f32 %v1517_v56, %v1509_v55 }
0x1277   :  { %2626 = vtanh.f32 %v3074_v57  ;;  %v1721_v28 = vrot.slane %v3074_v57, 6 }
0x127f   :  { %v2625_v58 = vpop.eup %2624 }
0x1280   :  { %1416 = vrot.lane.b32.xlu0 %v2625_v58, %s2706_s24 }
0x1281   :  { %v2627_v59 = vpop.eup %2626 }
0x1282   :  { %1522 = vrot.lane.b32.xlu1 %v2627_v59, %s2706_s24 }
0x12f2   :  { %v1417_v60 = vpop.permute.xlu0 %1416 }
0x12f3   :  { %v1419_v61 = vmul.f32 %v2621_v44, %v1417_v60 }
0x12f4   :  { %v1523_v63 = vpop.permute.xlu1 %1522 }
0x12f5   :  { %v1531_v62 = vrot.slane %v1419_v61, 4  ;;  %v1525_v2 = vmul.f32 %v2623_v48, %v1523_v63  ;;  %v1849_v61 = vld [vmem:[%s3150_s6 + $0x8] sm:$0xff] }
0x12f7   :  { %1532 = vrot.lane.b32.xlu1 %v1531_v62, %s2706_s24  ;;  %1527 = vrot.lane.b32.xlu0 %v1525_v2, %s2707_s3  ;;  %v1634_v3 = vrot.slane %v1525_v2, 4  ;;  %v1850_v62 = vld [vmem:[%s3150_s6 + $0x10] sm:$0xff]  ;;  %v1851_v2 = vld [vmem:[%s3150_s6 + $0x18] sm:$0xff] }
0x12fb   :  { %1635 = vrot.lane.b32.xlu0 %v1634_v3, %s2707_s3  ;;  %v2513_v3 = vpack.c.bf16 %v1851_v2, %v1850_v62 }
0x1369   :  { %v1533_v4 = vpop.permute.xlu1 %1532  ;;  %v1528_v6 = vpop.permute.xlu0 %1527 }
0x136a   :  { %v1535_v7 = vsel %vm159_vm3, %v1528_v6, %v1533_v4 }
0x136b   :  { %v1537_v8 = vrot.slane %v1535_v7, 4 }
0x136d   :  { %2322 = vmatmul.mubr.msk.f32.vlgmr.msra.gmra.mrb[14].mxu0 %vm263_vm4, %v1537_v8  ;;  %v1636_v9 = vpop.permute.xlu0 %1635 }
0x136e   :  { %2333 = vmatmul.mubr.msk.f32.vlgmr.msra.gmra.mrb[14].mxu1 %vm159_vm3, %v1636_v9  ;;  %2362 = vmatprep.mubr.msk.f32.mxu0 %vm2704_vm0, %v2705_v1  ;;  %v1987_v9 = vld [vmem:[%s3151_s7] ss:$0 sm:$0xff] }
0x136f   :  { %2499 = vmatpush3.bf16.msra.mxu1 %v2818_v32  ;;  %2351 = vmatprep.mubr.msk.f32.mxu1 %vm2704_vm0, %v2705_v1 }
0x1370   :  { %2500 = vmatprep.subr.bf16.mxu1 %v2703_v0 }
0x1373   :  { %2502 = vmatpush3.bf16.msra.mxu1 %v2824_v34 }
0x1374   :  { %2503 = vmatprep.subr.bf16.mxu1 %v2703_v0 }
0x1377   :  { %2505 = vmatpush3.bf16.msra.mxu1 %v2834_v37 }
0x1378   :  { %2506 = vmatprep.subr.bf16.mxu1 %v2703_v0 }
0x137b   :  { %2508 = vmatpush3.bf16.msra.mxu1 %v2845_v41 }
0x1440   :  { %v1606_v11 = vpop.f32.mrb[14].mxu0 }
0x1441   :  { %v1607_v12 = vadd.f32 %v2873_v46, %v1606_v11  ;;  %v2323_v14 = vpop.f32.mrb[15].mxu0  ;;  %v1705_v32 = vpop.f32.mrb[14].mxu1 }
0x1442   :  { %v1710_v16 = vrot.slane %v1705_v32, 2  ;;  %v2334_v17 = vpop.f32.mrb[15].mxu1 }
0x1443   :  { %2628 = vtanh.f32 %v1607_v12  ;;  %v1982_v37 = vmul.f32 -1.442695, %v1607_v12 }
0x1444   :  { %v1712_v1 = vadd.f32 %v1710_v16, %v2799_v13 }
0x1446   :  { %2630 = vtanh.f32 %v1712_v1  ;;  %v1984_v19 = vmul.f32 -1.442695, %v1712_v1 }
0x1447   :  { %2632 = vpow2.f32 %v1982_v37 }
0x1448   :  { %2634 = vpow2.f32 %v1984_v19 }
0x144d   :  { %v2629_v34 = vpop.eup %2628 }
0x144e   :  { %1619 = vrot.lane.b32.xlu1 %v2629_v34, %s2706_s24 }
0x1450   :  { %v2631_v18 = vpop.eup %2630 }
0x1451   :  { %1725 = vrot.lane.b32.xlu0 %v2631_v18, %s2706_s24  ;;  %v2633_v41 = vpop.eup %2632 }
0x1452   :  { %v2635_v20 = vpop.eup %2634  ;;  %v1613_v21 = vadd.f32 1.0, %v2633_v41 }
0x1453   :  { %v1716_v22 = vadd.f32 1.0, %v2635_v20 }
0x1454   :  { %2636 = vrcp.f32 %v1613_v21 }
0x1455   :  { %2638 = vrcp.f32 %v1716_v22 }
0x145e   :  { %v2637_v23 = vpop.eup %2636 }
0x145f   :  { %v2639_v25 = vpop.eup %2638  ;;  %v1617_v5 = vmul.f32 %v2637_v23, %v3071_v54 }
0x1460   :  { %v1723_v31 = vmul.f32 %v2639_v25, %v1721_v28 }
0x14c0   :  { %v1620_v24 = vpop.permute.xlu1 %1619 }
0x14c1   :  { %v1622_v13 = vmul.f32 %v2637_v23, %v1620_v24 }
0x14c3   :  { %1624 = vrot.lane.b32.xlu1 %v1622_v13, %s2707_s3  ;;  %v1726_v26 = vpop.permute.xlu0 %1725 }
0x14c4   :  { %v1728_v27 = vmul.f32 %v2639_v25, %v1726_v26 }
0x14c6   :  { %1730 = vrot.lane.b32.xlu0 %v1728_v27, %s2707_s3 }
0x1535   :  { %v1625_v29 = vpop.permute.xlu1 %1624 }
0x1536   :  { %v1627_v30 = vadd.f32 %v1625_v29, %v1617_v5 }
0x1538   :  { %2640 = vtanh.f32 %v1627_v30  ;;  %v1731_v33 = vpop.permute.xlu0 %1730 }
0x1539   :  { %v1733_v10 = vadd.f32 %v1731_v33, %v1723_v31 }
0x153b   :  { %2642 = vtanh.f32 %v1733_v10 }
0x1542   :  { %v2641_v35 = vpop.eup %2640 }
0x1543   :  { %1630 = vrot.lane.b32.xlu1 %v2641_v35, %s2706_s24 }
0x1545   :  { %v2643_v36 = vpop.eup %2642 }
0x1546   :  { %1736 = vrot.lane.b32.xlu0 %v2643_v36, %s2706_s24 }
0x15b5   :  { %v1631_v15 = vpop.permute.xlu1 %1630 }
0x15b6   :  { %v1633_v38 = vmul.f32 %v2637_v23, %v1631_v15 }
0x15b8   :  { %v1745_v39 = vrot.slane %v1633_v38, 2  ;;  %v1737_v40 = vpop.permute.xlu0 %1736 }
0x15b9   :  { %v1739_v42 = vmul.f32 %v2639_v25, %v1737_v40 }
0x15ba   :  { %1746 = vrot.lane.b32.xlu0 %v1745_v39, %s2706_s24 }
0x15bb   :  { %1741 = vrot.lane.b32.xlu1 %v1739_v42, %s2707_s3 }
0x162c   :  { %v1747_v43 = vpop.permute.xlu0 %1746 }
0x162d   :  { %v1742_v44 = vpop.permute.xlu1 %1741 }
0x162e   :  { %v1749_v45 = vsel %vm159_vm3, %v1742_v44, %v1747_v43 }
0x162f   :  { %v1751_v47 = vrot.slane %v1749_v45, 6 }
0x1631   :  { %2352 = vmatmul.mubr.msk.f32.vlgmr.msra.gmra.mrb[16].mxu1 %vm263_vm4, %v1751_v47 }
0x1704   :  { %v1820_v48 = vpop.f32.mrb[16].mxu1 }
0x1705   :  { %v1821_v49 = vadd.f32 %v2873_v46, %v1820_v48  ;;  %v2353_v50 = vpop.f32.mrb[17].mxu1  ;;  %v1848_v46 = vld [vmem:[%s3150_s6] sm:$0xff]  ;;  %s2708_s6 = smov [#allocation5]  }
0x1706   :  { %v2510_v63 = vpack.c.bf16 %v1849_v61, %v1848_v46  ;;  %s1942_s27 = sshll.u32 %s2708_s6, 4  ;;  %s1943_s27 = int_to_ptr.vmem [resolvable:$true] %s1942_s27 }
0x1707   :  { %2644 = vtanh.f32 %v1821_v49  ;;  %v1986_v52 = vmul.f32 -1.442695, %v1821_v49  ;;  %p2679_p9 = scmp.lt.s32.totalorder %s1943_s27, %s1943_s27 }
0x1708   :  { %2511 = vmatpush3.bf16.msra.mxu0 %v2510_v63 }
0x1709   :  { %2646 = vpow2.f32 %v1986_v52  ;;  %2512 = vmatprep.subr.bf16.mxu0 %v2703_v0 }
0x170c   :  { %2514 = vmatpush3.bf16.msra.mxu0 %v2513_v3 }
0x1711   :  { %v2645_v51 = vpop.eup %2644 }
0x1712   :  { %1833 = vrot.lane.b32.xlu1 %v2645_v51, %s2706_s24 }
0x1713   :  { %v2647_v53 = vpop.eup %2646 }
0x1714   :  { %v1827_v54 = vadd.f32 1.0, %v2647_v53 }
0x1716   :  { %2648 = vrcp.f32 %v1827_v54 }
0x1720   :  { %v2649_v55 = vpop.eup %2648 }
0x1721   :  { %v1831_v58 = vmul.f32 %v2649_v55, %v1627_v30 }
0x1784   :  { %v1834_v56 = vpop.permute.xlu1 %1833 }
0x1785   :  { %v1836_v57 = vmul.f32 %v2649_v55, %v1834_v56 }
0x1787   :  { %1838 = vrot.lane.b32.xlu0 %v1836_v57, %s2707_s3 }
0x17f9   :  { %v1839_v59 = vpop.permute.xlu0 %1838 }
0x17fa   :  { %v1841_v60 = vadd.f32 %v1839_v59, %v1831_v58 }
0x17fc   :  { %2650 = vtanh.f32 %v1841_v60 }
0x1806   :  { %v2651_v4 = vpop.eup %2650 }
0x1807   :  { %1844 = vrot.lane.b32.xlu1 %v2651_v4, %s2706_s24  ;;  %s2674_s24 = scalar_lea.vmem %s1943_s27, 32 }
0x1808   :  { %p2675_p8 = scmp.ne.s32.totalorder %s1943_s27, %s2674_s24  ;;  %p2680_p10 = scmp.lt.s32.totalorder %s2674_s24, %s2674_s24 }
0x180a   :  { %p2681_p11 = por %p2680_p10, %p2679_p9 }
0x180c   :  { %p2682_p12 = pnand %p2681_p11, %p2675_p8 }
0x1879   :  { %v1845_v6 = vpop.permute.xlu1 %1844 }
0x187a   :  { %v1847_v7 = vmul.f32 %v2649_v55, %v1845_v6 }
0x187c   :  { %1860 = vrot.lane.b32.xlu0 %v1847_v7, %s2707_s3 }
0x18ee   :  { %v1861_v8 = vpop.permute.xlu0 %1860 }
0x18ef   :  { %2363 = vmatmul.mubr.msk.f32.vlgmr.msra.gmra.mrb[16].mxu0 %vm159_vm3, %v1861_v8 }
0x19c2   :  { %v1930_v11 = vpop.f32.mrb[16].mxu0 }
0x19c3   :  { %v1931_v0 = vadd.f32 %v1987_v9, %v1930_v11  ;;  %v2364_v12 = vpop.f32.mrb[17].mxu0 }
0x19c5   :  { %1935 = vst.msk [vmem:[#allocation5] sm:$0x3] %vm1934_vm5, %v1931_v0 }
0x19c6   :  { %2685 = shalt.err (!%p2682_p12)
}
0x19c7   :  { %s2686_s29 = scalar_lea.hbm %s3152_s8, 32 }
0x19c8   :  { %p2687_p13 = scmp.ne.s32.totalorder %s3152_s8, %s2686_s29  ;;  %p2690_p0 = scmp.lt.u32.totalorder %s2686_s29, %s3152_s8 }
0x19ca   :  { %p2692_p1 = pnand %p2690_p0, %p2687_p13 }
0x19cc   :  { %2695 = shalt.err (!%p2692_p1)
}
0x19cd   :  { %1945 = dma.vmem_to_hbm [thread:$0]  %s1943_s27, 32, %s3152_s8, [#allocation4]  }
0x19ce   :  { %2698 = dma.done.wait [#allocation4], 32  }
0x19cf   :  { %2699 = vsyncadd [#allocation4], 4294967264 }
0x19d0   :  { %1949 = vsyncpa [#allocation3], 1 }
0x19d1   :  { %1950 = vsyncpa [#allocation4], 1 }

</bundles_post_ra>
